<compile_context>
chip_gen: v5e
topology: v5e:2x2
jax: 0.10.0
libtpu: 0.0.40
codegen_flags: <defaults>
</compile_context>

<pallas_src>
import jax
import jax.numpy as jnp
import numpy as np
from jax.experimental import pallas as pl
from jax.experimental.pallas import tpu as pltpu

EPS = 1e-5  # nn.BatchNorm2d default


def _fused_phase_weights(w_oihw):
    """(Cout, Cin, 3, 3) OIHW -> single fused (9*Cin, 4*Cout) weight.

    A 3x3 conv on a 2x nearest-upsampled image equals, per output "phase"
    (ph, pw) in {0,1}^2, a 2x2 conv on the ORIGINAL-resolution (padded) input.
    All 4 phases only read taps inside one 3x3 window of the padded original
    input, so they fuse into ONE matmul: im2col patch (M, 9*Cin) @
    (9*Cin, 4*Cout), where output column block p = 2*ph + pw is phase (ph, pw).
    """
    cout, cin = int(w_oihw.shape[0]), int(w_oihw.shape[1])
    w_hwio = jnp.transpose(w_oihw, (2, 3, 1, 0)).astype(jnp.float32)  # (3,3,Ci,Co)
    wf = jnp.zeros((3, 3, cin, 4, cout), jnp.float32)
    for ph in range(2):
        for pw in range(2):
            p = 2 * ph + pw
            for dy in range(3):
                for dx in range(3):
                    ry = (ph + dy - 1) // 2 - ph + 1   # in {0, 1}
                    rx = (pw + dx - 1) // 2 - pw + 1   # in {0, 1}
                    wf = wf.at[ph + ry, pw + rx, :, p, :].add(w_hwio[dy, dx])
    return wf.reshape(9 * cin, 4 * cout)


def _conv_all_phases(x_ref, w_ref):
    """One fused MXU matmul computing all 4 sub-pixel phases.

    x_ref: (Th+2, Ww+2, Cin) bf16 zero-padded original-resolution tile.
    w_ref: (9*Cin, 4*Cout) bf16 fused phase weights.
    Returns f32 (Th*Ww, 4*Cout); column block p = 2*ph + pw is output pixel
    (2*i + ph, 2*j + pw) for original input pixel (i, j).
    """
    Th = x_ref.shape[0] - 2
    Ww = x_ref.shape[1] - 2
    Cin = x_ref.shape[2]
    x = x_ref[...]
    # TODO(synk): lane-fold W into the last dim + pltpu.roll tap extraction for
    # better lane density at tiny Cin (perf-review item 2).
    taps = [x[dy:dy + Th, dx:dx + Ww, :] for dy in range(3) for dx in range(3)]
    patch = jnp.concatenate(taps, axis=-1).reshape(Th * Ww, 9 * Cin)
    return jnp.dot(patch, w_ref[...], preferred_element_type=jnp.float32)


def upblock_stats_kernel(x_ref, w_ref, stats_ref):
    """Pass 1: per-tile per-(phase, channel) sum / sum-of-squares of the conv."""
    conv = _conv_all_phases(x_ref, w_ref)               # (M, 4*Cout) f32
    s = jnp.sum(conv, axis=0, keepdims=True)            # (1, 4*Cout)
    ss = jnp.sum(conv * conv, axis=0, keepdims=True)    # (1, 4*Cout)
    stats_ref[...] = jnp.concatenate([s, ss], axis=0)   # (2, 4*Cout)


def upblock_apply_kernel(x_ref, w_ref, affine_ref, o_ref):
    """Pass 2: conv -> folded-BN affine -> ReLU -> lane-dense store."""
    Th = x_ref.shape[0] - 2
    Ww = x_ref.shape[1] - 2
    conv = _conv_all_phases(x_ref, w_ref)                # (Th*Ww, 4*Cout) f32
    scale = affine_ref[0:1, :]                           # (1, 4*Cout)
    shift = affine_ref[1:2, :]
    y = jnp.maximum(conv * scale + shift, 0.0)
    # Row-major (Th*Ww, 4*Cout) -> (Th, Ww*4*Cout): lane order (j, ph, pw, c),
    # i.e. both upsampled rows of original row i land on one lane-dense row.
    o_ref[...] = y.reshape(Th, Ww * y.shape[-1]).astype(o_ref.dtype)


def _pick_row_tile(hin, win, cin, cout, budget_bytes=20 * 1024 * 1024):
    """Largest divisor of hin whose double-buffered blocks fit the VMEM budget
    (budget chosen for the smallest VMEM generation, v7x: 64 MiB physical)."""
    in_row = (win + 2) * cin * 2            # bf16 input bytes per padded row
    out_row = win * 4 * cout * 4            # f32 output bytes per original row
    best = 1
    for rt in range(1, hin + 1):
        if hin % rt:
            continue
        dbuf = 2 * ((rt + 2) * in_row + rt * out_row)   # double-buffered blocks
        if dbuf <= budget_bytes and rt * out_row <= (2 << 20):
            best = rt
    return best


def upblock_forward(x_nchw, w_oihw, b, gamma, beta, *, row_tile=None):
    """Forward pass matching UpBlock(in_ch, out_ch)(x) in training mode."""
    N, Cin, Hin, Win = (int(d) for d in x_nchw.shape)
    Cout = int(w_oihw.shape[0])
    H, W = 2 * Hin, 2 * Win

    if row_tile is None:
        row_tile = _pick_row_tile(Hin, Win, Cin, Cout)
    if Hin % row_tile:
        row_tile = Hin
    num_rt = Hin // row_tile
    grid = (N, num_rt)

    # Single input pass: NCHW -> NHWC, zero-pad(1), cast to bf16 (MXU dtype).
    # The 2x upsample is never materialized - it is folded into the weights.
    x_nhwc = jnp.transpose(x_nchw, (0, 2, 3, 1)).astype(jnp.bfloat16)
    x_pad = jnp.pad(x_nhwc, ((0, 0), (1, 1), (1, 1), (0, 0)))
    if num_rt == 1:
        # Whole padded image per grid step: free expand_dims, no halo copies.
        x_tiles = x_pad[:, None]             # (N, 1, Hin+2, Win+2, Cin)
    else:
        # Fallback for large images only: row tiles with a duplicated 2-row halo.
        # TODO(synk): replace with pl.Element row offsets / manual DMA (P4) to
        # drop the duplicated-halo HBM pass when num_rt > 1.
        x_tiles = jnp.stack(
            [x_pad[:, r * row_tile: r * row_tile + row_tile + 2]
             for r in range(num_rt)], axis=1)

    w_fused = _fused_phase_weights(w_oihw).astype(jnp.bfloat16)   # (9*Cin, 4*Cout)
    # NOTE: the Conv2d bias is cancelled by train-mode BatchNorm (it only
    # shifts the batch mean, which BN subtracts), so it never reaches the
    # kernels.  It must be reinstated if eval-mode / running stats are used.
    del b

    x_spec = pl.BlockSpec((None, None, row_tile + 2, Win + 2, Cin),
                          lambda n, r: (n, r, 0, 0, 0))
    w_spec = pl.BlockSpec((9 * Cin, 4 * Cout), lambda n, r: (0, 0))

    cparams = pltpu.CompilerParams(
        dimension_semantics=("parallel", "parallel"),
        vmem_limit_bytes=32 * 1024 * 1024)

    conv_flops = 2 * N * Hin * Win * (9 * Cin) * (4 * Cout)
    in_bytes = int(x_tiles.size) * 2 + int(w_fused.size) * 2

    # ---- Pass 1: conv + per-tile partial batch statistics -------------------
    stats = pl.pallas_call(
        upblock_stats_kernel,
        out_shape=jax.ShapeDtypeStruct((N * num_rt, 2, 4 * Cout), jnp.float32),
        grid=grid,
        in_specs=[x_spec, w_spec],
        out_specs=pl.BlockSpec((None, 2, 4 * Cout),
                               lambda n, r: (n * num_rt + r, 0, 0)),
        compiler_params=cparams,
        cost_estimate=pl.CostEstimate(
            flops=conv_flops + 3 * N * H * W * Cout,
            transcendentals=0,
            bytes_accessed=in_bytes + N * num_rt * 2 * 4 * Cout * 4),
    )(x_tiles, w_fused)

    # Tiny wrapper reduction: fold BN (batch stats, biased variance) into one
    # per-channel affine; the x4 phase tile is hoisted here (done once).
    count = jnp.float32(N * H * W)
    red = jnp.sum(stats.reshape(N * num_rt, 2, 4, Cout), axis=(0, 2))  # (2, Cout)
    mean = red[0] / count
    var = jnp.maximum(red[1] / count - mean * mean, 0.0)   # clamp f32 cancellation
    scale = gamma.astype(jnp.float32) * jax.lax.rsqrt(var + EPS)
    shift = beta.astype(jnp.float32) - mean * scale
    affine = jnp.stack([jnp.tile(scale, 4), jnp.tile(shift, 4)], axis=0)  # (2, 4*Cout)

    # ---- Pass 2: recompute conv, affine + ReLU, lane-dense store ------------
    out3d = pl.pallas_call(
        upblock_apply_kernel,
        out_shape=jax.ShapeDtypeStruct((N * num_rt, row_tile, Win * 4 * Cout),
                                       jnp.float32),
        grid=grid,
        in_specs=[x_spec, w_spec,
                  pl.BlockSpec((2, 4 * Cout), lambda n, r: (0, 0))],
        out_specs=pl.BlockSpec((None, row_tile, Win * 4 * Cout),
                               lambda n, r: (n * num_rt + r, 0, 0)),
        compiler_params=cparams,
        cost_estimate=pl.CostEstimate(
            flops=conv_flops + 3 * N * H * W * Cout,
            transcendentals=0,
            bytes_accessed=in_bytes + N * H * W * Cout * 4 + 2 * 4 * Cout * 4),
    )(x_tiles, w_fused, affine)

    # Single output pass: de-interleave phases (n, i, j, ph, pw, c) -> NCHW.
    out = out3d.reshape(N, Hin, Win, 2, 2, Cout)
    out = jnp.transpose(out, (0, 5, 1, 3, 2, 4)).reshape(N, Cout, H, W)
    return out


def upblock_reference(x_nchw, w_oihw, b, gamma, beta):
    """Pure-JAX f32 reference for correctness checking (includes the conv bias)."""
    x_up = jnp.repeat(jnp.repeat(x_nchw, 2, axis=2), 2, axis=3)
    conv = jax.lax.conv_general_dilated(
        x_up, w_oihw, window_strides=(1, 1), padding=((1, 1), (1, 1)),
        dimension_numbers=("NCHW", "OIHW", "NCHW"))
    conv = conv + b[None, :, None, None]
    mean = jnp.mean(conv, axis=(0, 2, 3), keepdims=True)
    var = jnp.mean((conv - mean) ** 2, axis=(0, 2, 3), keepdims=True)
    y = (conv - mean) / jnp.sqrt(var + EPS)
    y = y * gamma[None, :, None, None] + beta[None, :, None, None]
    return jnp.maximum(y, 0.0)


if __name__ == "__main__":
    in_channels, out_channels = 4, 8
    N, Hin, Win = 2, 16, 16

    key = jax.random.PRNGKey(0)
    kx, kw, kb = jax.random.split(key, 3)

    x = jax.random.normal(kx, (N, in_channels, Hin, Win), jnp.float32)
    # Deterministic parameter init (synthetic; not a checkpoint load).
    w = 0.1 * jax.random.normal(
        kw, (out_channels, in_channels, 3, 3), jnp.float32)
    bias = 0.1 * jax.random.normal(kb, (out_channels,), jnp.float32)
    gamma = jnp.ones((out_channels,), jnp.float32)   # BN default init
    beta = jnp.zeros((out_channels,), jnp.float32)   # BN default init

    out = jax.block_until_ready(upblock_forward(x, w, bias, gamma, beta))

    ref = upblock_reference(x, w, bias, gamma, beta)
    # bf16 MXU operands (f32 accumulation) -> compare at bf16-appropriate tol.
    np.testing.assert_allclose(np.asarray(out), np.asarray(ref),
                               rtol=2e-2, atol=2e-2)

    assert out.shape == (N, out_channels, 2 * Hin, 2 * Win)
    print("KERNEL_OK")
</pallas_src>

<mosaic_0001>
module attributes {stable_mosaic.version = 11 : i64} {
  func.func @upblock_stats_kernel(%arg0: i32, %arg1: i32, %arg2: memref<1x1x18x18x4xbf16, #tpu.memory_space<vmem>>, %arg3: memref<36x32xbf16, #tpu.memory_space<vmem>>, %arg4: memref<1x2x32xf32, #tpu.memory_space<vmem>>) attributes {dimension_semantics = [#tpu.dimension_semantics<parallel>, #tpu.dimension_semantics<parallel>], iteration_bounds = array<i64: 2, 1>, scalar_prefetch = 0 : i64, scratch_operands = 0 : i64, tpu.core_type = #tpu.core_type<tc>, window_params = [{transform_indices = @transform_0, window_bounds = array<i64: 1, 1, 18, 18, 4>}, {pipeline_mode = #tpu.pipeline_mode<synchronous>, transform_indices = @transform_1, window_bounds = array<i64: 36, 32>}, {transform_indices = @transform_2, window_bounds = array<i64: 1, 2, 32>}]} {
    %c0 = arith.constant 0 : index
    %c0_0 = arith.constant 0 : index
    %c0_1 = arith.constant 0 : index
    %c0_2 = arith.constant 0 : index
    %c0_3 = arith.constant 0 : index
    %0 = vector.load %arg2[%c0, %c0_0, %c0_1, %c0_2, %c0_3] : memref<1x1x18x18x4xbf16, #tpu.memory_space<vmem>>, vector<1x1x18x18x4xbf16>
    %1 = vector.shape_cast %0 : vector<1x1x18x18x4xbf16> to vector<18x18x4xbf16>
    %2 = vector.extract_strided_slice %1 {offsets = [0, 0, 0], sizes = [16, 16, 4], strides = [1, 1, 1]} : vector<18x18x4xbf16> to vector<16x16x4xbf16>
    %3 = vector.extract_strided_slice %1 {offsets = [0, 1, 0], sizes = [16, 16, 4], strides = [1, 1, 1]} : vector<18x18x4xbf16> to vector<16x16x4xbf16>
    %4 = vector.extract_strided_slice %1 {offsets = [0, 2, 0], sizes = [16, 16, 4], strides = [1, 1, 1]} : vector<18x18x4xbf16> to vector<16x16x4xbf16>
    %5 = vector.extract_strided_slice %1 {offsets = [1, 0, 0], sizes = [16, 16, 4], strides = [1, 1, 1]} : vector<18x18x4xbf16> to vector<16x16x4xbf16>
    %6 = vector.extract_strided_slice %1 {offsets = [1, 1, 0], sizes = [16, 16, 4], strides = [1, 1, 1]} : vector<18x18x4xbf16> to vector<16x16x4xbf16>
    %7 = vector.extract_strided_slice %1 {offsets = [1, 2, 0], sizes = [16, 16, 4], strides = [1, 1, 1]} : vector<18x18x4xbf16> to vector<16x16x4xbf16>
    %8 = vector.extract_strided_slice %1 {offsets = [2, 0, 0], sizes = [16, 16, 4], strides = [1, 1, 1]} : vector<18x18x4xbf16> to vector<16x16x4xbf16>
    %9 = vector.extract_strided_slice %1 {offsets = [2, 1, 0], sizes = [16, 16, 4], strides = [1, 1, 1]} : vector<18x18x4xbf16> to vector<16x16x4xbf16>
    %10 = vector.extract_strided_slice %1 {offsets = [2, 2, 0], sizes = [16, 16, 4], strides = [1, 1, 1]} : vector<18x18x4xbf16> to vector<16x16x4xbf16>
    %11 = tpu.concatenate %2, %3, %4, %5, %6, %7, %8, %9, %10 in 2 : vector<16x16x4xbf16>, vector<16x16x4xbf16>, vector<16x16x4xbf16>, vector<16x16x4xbf16>, vector<16x16x4xbf16>, vector<16x16x4xbf16>, vector<16x16x4xbf16>, vector<16x16x4xbf16>, vector<16x16x4xbf16> -> vector<16x16x36xbf16>
    %12 = vector.shape_cast %11 : vector<16x16x36xbf16> to vector<256x36xbf16>
    %c0_4 = arith.constant 0 : index
    %c0_5 = arith.constant 0 : index
    %13 = vector.load %arg3[%c0_4, %c0_5] : memref<36x32xbf16, #tpu.memory_space<vmem>>, vector<36x32xbf16>
    %cst = arith.constant dense<0.000000e+00> : vector<256x32xf32>
    %14 = tpu.matmul %12, %13, %cst {dimension_numbers = #tpu.dot_dimension_numbers<[1], [0], [0], [1], [0, 0, 1, 1], [], []>} : vector<256x36xbf16>, vector<36x32xbf16>, vector<256x32xf32> -> vector<256x32xf32>
    %cst_6 = arith.constant dense<0.000000e+00> : vector<32xf32>
    %15 = vector.multi_reduction <add>, %14, %cst_6 [0] : vector<256x32xf32> to vector<32xf32>
    %16 = vector.shape_cast %15 : vector<32xf32> to vector<1x32xf32>
    %17 = arith.mulf %14, %14 : vector<256x32xf32>
    %cst_7 = arith.constant dense<0.000000e+00> : vector<32xf32>
    %18 = vector.multi_reduction <add>, %17, %cst_7 [0] : vector<256x32xf32> to vector<32xf32>
    %19 = vector.shape_cast %18 : vector<32xf32> to vector<1x32xf32>
    %20 = tpu.concatenate %16, %19 in 0 : vector<1x32xf32>, vector<1x32xf32> -> vector<2x32xf32>
    %c0_8 = arith.constant 0 : index
    %c0_9 = arith.constant 0 : index
    %c0_10 = arith.constant 0 : index
    %21 = vector.load %arg4[%c0_8, %c0_9, %c0_10] : memref<1x2x32xf32, #tpu.memory_space<vmem>>, vector<1x2x32xf32>
    %22 = vector.shape_cast %21 : vector<1x2x32xf32> to vector<2x32xf32>
    %23 = vector.shape_cast %20 : vector<2x32xf32> to vector<1x2x32xf32>
    tpu.vector_store %arg4[%c0_8, %c0_9, %c0_10], %23 {strides = array<i32>} : memref<1x2x32xf32, #tpu.memory_space<vmem>>, vector<1x2x32xf32>,
    return
  }
  func.func @transform_0(%arg0: i32, %arg1: i32) -> (i32, i32, i32, i32, i32) {
    %c0_i32 = arith.constant 0 : i32
    %c0_i32_0 = arith.constant 0 : i32
    %c0_i32_1 = arith.constant 0 : i32
    %c0_i32_2 = arith.constant 0 : i32
    return %arg0, %arg1, %c0_i32, %c0_i32_0, %c0_i32_1 : i32, i32, i32, i32, i32
  }
  func.func @transform_1(%arg0: i32, %arg1: i32) -> (i32, i32) {
    %c0_i32 = arith.constant 0 : i32
    %c0_i32_0 = arith.constant 0 : i32
    %c0_i32_1 = arith.constant 0 : i32
    return %c0_i32, %c0_i32_0 : i32, i32
  }
  func.func @transform_2(%arg0: i32, %arg1: i32) -> (i32, i32, i32) {
    %c1_i32 = arith.constant 1 : i32
    %0 = arith.muli %arg0, %c1_i32 : i32
    %1 = arith.addi %0, %arg1 : i32
    %c0_i32 = arith.constant 0 : i32
    %c0_i32_0 = arith.constant 0 : i32
    %c0_i32_1 = arith.constant 0 : i32
    return %1, %c0_i32, %c0_i32_0 : i32, i32, i32
  }
}

</mosaic_0001>

<bundles_post_ra>
// kernel: tpu_custom_call.1
= control target key start
LH: loop header
LB: loop body
LE: loop exit
PB: predicated region body
PF: predicated region fallthrough
CT: control target
= control target key end

     0   :  { %7 = vsyncpa [#allocation3], 0  ;;  %s2803_s0 = inlined_call_operand.vmem [shape: bf16[2,1,18,18,4], index: 0, kind: input, shape index: {}]   ;;  %s2804_s1 = inlined_call_operand.vmem [shape: bf16[36,32], index: 1, kind: input, shape index: {}]   ;;  %s2805_s2 = inlined_call_operand.hbm [shape: f32[2,2,32], index: 2, kind: output, shape index: {}]  }
   0x1   :  { %9 = vsyncpa [#allocation3 + $0x1], 0  ;;  %s1880_s9 = smov 0   ;;  %s1882_s10 = smov 0  }
   0x2   :  { %s1884_s11 = smov 0   ;;  %s1886_s12 = smov 0  }
   0x3   :  { %s1888_s13 = smov 0   ;;  %s1890_s14 = smov 0  }
   0x4 LB: > { %s1576_s15 = sadd.s32 4294967295, %s1855_s14   ;;  %s1577_s16 = sadd.s32 4294967294, %s1855_s14   ;;  %s1855_s14 = sphi %s1890_s14, %s15_s14   ;;  %s1851_s13 = sphi %s1888_s13, %s2814_s13   ;;  %s1847_s12 = sphi %s1886_s12, %s2813_s12   ;;  %s1843_s11 = sphi %s1884_s11, %s2812_s11   ;;  %s1839_s10 = sphi %s1882_s10, %s2811_s10   ;;  %s1835_s9 = sphi %s1880_s9, %s2810_s9  }
   0x5   : > { %s27_s17 = sadd.s32 1, %s1851_s13  ;;  %s85_s18 = sadd.s32 1, %s1843_s11 }
   0x6   : > { %p29_p0 = scmp.ge.s32.totalorder %s27_s17, 2  ;;  %p95_p1 = scmp.ne.s32.totalorder %s1843_s11, %s1839_s10 }
   0x7   : > { %p96_p2 = scmp.eq.s32.totalorder %s1576_s15, 1  ;;  %p101_p3 = scmp.ne.s32.totalorder %s1839_s10, %s1835_s9 }
   0x8   : > { %s2816_s17 = smov (%p29_p0, %s27_s17), 0  ;;  %p102_p5 = scmp.eq.s32.totalorder %s1577_s16, 1 }
   0x9   : > { %p1920_p4 = por %p96_p2, %p95_p1  ;;  %s82_s20 = ssub.s32 %s1851_s13, %s2816_s17 }
   0xa   : > { %p1580_p6 = scmp.ge.s32.totalorder %s1855_s14, 1  ;;  %p83_p7 = scmp.eq.s32.totalorder %s82_s20, 0 }
   0xb   : > { %p1927_p8 = por %p102_p5, %p101_p3  ;;  %p135_p9 = scmp.lt.s32.totalorder %s1855_s14, 3 }
   0xc   : > { %s1933_s22 = scalar_select %p83_p7, %s1843_s11, %s85_s18  }
   0xd   : > { %p136_p10 = pnand %p1580_p6, %p135_p9 }
   0xf   : > { %139 = sbr.rel (%p136_p10) target bundleno = 652 (0x28c), region = 28 }
  0x14   : > { %p161_p11 = scmp.lt.s32.totalorder %s1847_s12, 1  ;;  %vm354_vm0 = vsmask.f32 7424  ;;  %s1857_s28 = smov 4   ;;  %vm579_vm1 = vcmask 1046528   ;;  %vm931_vm2 = vcmask 64512  }
  0x15   : > { %s1858_s29 = smov 8   ;;  %s1859_s30 = smov 20   ;;  %vm898_vm3 = vcmask 31744   ;;  %vm1215_vm4 = vcmask 1041408   ;;  %vm964_vm5 = vcmask 97280   ;;  %vm997_vm6 = vcmask 130048  }
  0x16   : > { %s162_s23 = scalar_select %p161_p11, %s1847_s12, 1  ;;  %vm1030_vm7 = vcmask 162816   ;;  %vm1063_vm8 = vcmask 195584   ;;  %vm1096_vm9 = vcmask 228352   ;;  %vm1129_vm10 = vcmask 261120  }
  0x17   : > { %s1860_s3 = smov 16   ;;  %s1861_s4 = smov 12   ;;  %vm1182_vm11 = vcmask 293888   ;;  %vm1478_vm12 = vcmask 1040384   ;;  %vm1480_vm13 = vcmask 254976  }
  0x18   : > { %s1712_s24 = smul.u32 216, %s162_s23  ;;  %s1862_s5 = smov 32  }
  0x19   : > { %s1863_s6 = smov 28   ;;  %s1864_s7 = smov 24  }
  0x1a   : > { %s1940_s27 = scalar_lea.vmem %s2803_s0, %s1712_s24  ;;  %s158_s24 = sand.u32 1, %s1839_s10  }
  0x1b   : > { %v1943_v0 = vld [vmem:[%s1940_s27 + $0x30] sm:$0xff]  ;;  %v186_v1 = vld [vmem:[%s1940_s27 + $0x38] sm:$0x1]  ;;  %v180_v4 = vld [vmem:[%s1940_s27 + $0x20] sm:$0x1]  ;;  %s1581_s25 = sshll.u32 %s158_s24, 1 }
  0x1c   : > { %v1947_v2 = vld [vmem:[%s1940_s27 + $0x18] sm:$0xff]  ;;  %v326_v3 = vunpack.c.l.b16 %v186_v1  ;;  %v1951_v5 = vld [vmem:[%s1940_s27] sm:$0xff]  ;;  %v174_v6 = vld [vmem:[%s1940_s27 + $0x8] sm:$0x1]  ;;  %v404_v7 = vshrl.u32 %v1943_v0, 16  ;;  %v406_v8 = vshll.u32 %v1943_v0, 16  ;;  %v324_v9 = vunpack.c.l.b16 %v180_v4 }
  0x1d   : > { %v380_v10 = vshrl.u32 %v1947_v2, 16  ;;  %v189_v11 = vld [vmem:[%s1940_s27 + $0x44] sm:$0x1]  ;;  %v382_v13 = vshll.u32 %v1947_v2, 16  ;;  %v322_v14 = vunpack.c.l.b16 %v174_v6  ;;  %v356_v15 = vshrl.u32 %v1951_v5, 16  ;;  %v1963_v16 = vld [vmem:[%s1940_s27 + $0x3c] sm:$0xff] }
  0x1e   : > { %v1958_v12 = vpack.c.b16 %v326_v3, %v326_v3  ;;  %v408_v17 = vrot.slane %v406_v8, 1  ;;  %v1965_v18 = vpack.c.b16 %v324_v9, %v324_v9  ;;  %v358_v19 = vshll.u32 %v1951_v5, 16  ;;  %v183_v25 = vld [vmem:[%s1940_s27 + $0x2c] sm:$0x1]  ;;  %v1977_v30 = vld [vmem:[%s1940_s27 + $0x24] sm:$0xff]  ;;  %v2010_v59 = vld [vmem:[%s1940_s27 + $0x54] sm:$0xff] }
  0x1f   : > { %v327_v20 = vunpack.c.l.b16 %v189_v11  ;;  %v384_v22 = vrot.slane %v382_v13, 1  ;;  %v1969_v23 = vpack.c.b16 %v322_v14, %v322_v14  ;;  %v416_v24 = vshrl.u32 %v1963_v16, 16  ;;  %v1983_v39 = vld [vmem:[%s1940_s27 + $0xc] sm:$0xff]  ;;  %v177_v40 = vld [vmem:[%s1940_s27 + $0x14] sm:$0x1]  ;;  %v1991_v45 = vld [vmem:[%s1940_s27 + $0x60] sm:$0xff] }
  0x20   : > { %v411_v21 = vshll.u32 %v1958_v12, 16  ;;  %v409_v26 = vor.u32 %v408_v17, %v404_v7  ;;  %v387_v27 = vshll.u32 %v1965_v18, 16  ;;  %v360_v28 = vrot.slane %v358_v19, 1  ;;  %v198_v46 = vld [vmem:[%s1940_s27 + $0x68] sm:$0x1]  ;;  %s1680_s26 = sshll.u32 %s1847_s12, 1 }
  0x21   : > { %v1974_v29 = vpack.c.b16 %v327_v20, %v327_v20  ;;  %v385_v32 = vor.u32 %v384_v22, %v380_v10  ;;  %v363_v33 = vshll.u32 %v1969_v23, 16  ;;  %v418_v34 = vshll.u32 %v1963_v16, 16  ;;  %v195_v60 = vld [vmem:[%s1940_s27 + $0x5c] sm:$0x1]  ;;  %v2023_v8 = vld [vmem:[%s1940_s27 + $0x48] sm:$0xff]  ;;  %s1483_s12 = scalar_lea.sflag [#allocation3], %s158_s24 }
  0x22   : > { %v413_v31 = vrot.slane %v411_v21, 1  ;;  %v389_v35 = vrot.slane %v387_v27, 1  ;;  %v361_v36 = vor.u32 %v360_v28, %v356_v15  ;;  %v325_v38 = vunpack.c.l.b16 %v183_v25  ;;  %v192_v9 = vld [vmem:[%s1940_s27 + $0x50] sm:$0x1]  ;;  %v207_v21 = vld [vmem:[%s1940_s27 + $0x8c] sm:$0x1] }
  0x23   : > { %v423_v37 = vshll.u32 %v1974_v29, 16  ;;  %v365_v42 = vrot.slane %v363_v33, 1  ;;  %v420_v43 = vrot.slane %v418_v34, 1  ;;  %v392_v44 = vshrl.u32 %v1977_v30, 16  ;;  %v2037_v27 = vld [vmem:[%s1940_s27 + $0x84] sm:$0xff]  ;;  %v2044_v34 = vld [vmem:[%s1940_s27 + $0x78] sm:$0xff] }
  0x24   : > { %v1987_v41 = vsel %vm354_vm0, %v409_v26, %v413_v31  ;;  %v1997_v47 = vsel %vm354_vm0, %v385_v32, %v389_v35  ;;  %v1999_v49 = vpack.c.b16 %v325_v38, %v325_v38  ;;  %v394_v50 = vshll.u32 %v1977_v30, 16  ;;  %s1797_s15 = scalar_lea.hbm %s2805_s2, 4 }
  0x25   : > { %555 = vrot.lane.b32.xlu2 %v1987_v41, %s1857_s28  ;;  %v425_v48 = vrot.slane %v423_v37, 1  ;;  %551 = vrot.lane.b32.xlu1 %v1997_v47, %s1857_s28  ;;  %v366_v51 = vsel %vm354_vm0, %v361_v36, %v365_v42  ;;  %v421_v52 = vor.u32 %v420_v43, %v416_v24  ;;  %v323_v53 = vunpack.c.l.b16 %v177_v40  ;;  %v204_v40 = vld [vmem:[%s1940_s27 + $0x80] sm:$0x1] }
  0x26   : > { %v368_v54 = vshrl.u32 %v1983_v39, 16  ;;  %547 = vrot.lane.b32.xlu0 %v366_v51, %s1857_s28  ;;  %v396_v55 = vrot.slane %v394_v50, 1  ;;  %v399_v56 = vshll.u32 %v1999_v49, 16  ;;  %v370_v57 = vshll.u32 %v1983_v39, 16 }
  0x27   : > { %v330_v58 = vunpack.c.l.b16 %v198_v46  ;;  %v2014_v61 = vsel %vm354_vm0, %v421_v52, %v425_v48  ;;  %v2016_v62 = vpack.c.b16 %v323_v53, %v323_v53  ;;  %v452_v63 = vshrl.u32 %v1991_v45, 16  ;;  %v2063_v52 = vld [vmem:[%s1940_s27 + $0x6c] sm:$0xff]  ;;  %v201_v53 = vld [vmem:[%s1940_s27 + $0x74] sm:$0x1] }
  0x28   : > { %v454_v1 = vshll.u32 %v1991_v45, 16  ;;  %v397_v3 = vor.u32 %v396_v55, %v392_v44  ;;  %v401_v4 = vrot.slane %v399_v56, 1  ;;  %v372_v6 = vrot.slane %v370_v57, 1 }
  0x29   : > { %v2020_v7 = vpack.c.b16 %v330_v58, %v330_v58  ;;  %v375_v10 = vshll.u32 %v2016_v62, 16  ;;  %v329_v13 = vunpack.c.l.b16 %v195_v60  ;;  %v440_v14 = vshrl.u32 %v2010_v59, 16  ;;  %v2071_v58 = vld [vmem:[%s1940_s27 + $0xa8] sm:$0xff] }
  0x2a   : > { %v456_v11 = vrot.slane %v454_v1, 1  ;;  %v2029_v15 = vsel %vm354_vm0, %v397_v3, %v401_v4  ;;  %v373_v17 = vor.u32 %v372_v6, %v368_v54  ;;  %v442_v20 = vshll.u32 %v2010_v59, 16  ;;  %v216_v4 = vld [vmem:[%s1940_s27 + $0xb0] sm:$0x1] }
  0x2b   : > { %v459_v19 = vshll.u32 %v2020_v7, 16  ;;  %v377_v22 = vrot.slane %v375_v10, 1  ;;  %v2034_v25 = vpack.c.b16 %v329_v13, %v329_v13  ;;  %v328_v26 = vunpack.c.l.b16 %v192_v9 }
  0x2c   : > { %v457_v24 = vor.u32 %v456_v11, %v452_v63  ;;  %v444_v31 = vrot.slane %v442_v20, 1  ;;  %v428_v32 = vshrl.u32 %v2023_v8, 16  ;;  %v430_v33 = vshll.u32 %v2023_v8, 16  ;;  %v2087_v20 = vld [vmem:[%s1940_s27 + $0x9c] sm:$0xff] }
  0x2d   : > { %557 = vrot.lane.b32.xlu2 %v2014_v61, %s1857_s28  ;;  %v461_v28 = vrot.slane %v459_v19, 1  ;;  %553 = vrot.lane.b32.xlu1 %v2029_v15, %s1857_s28  ;;  %v2049_v35 = vsel %vm354_vm0, %v373_v17, %v377_v22  ;;  %v447_v36 = vshll.u32 %v2034_v25, 16  ;;  %v2052_v37 = vpack.c.b16 %v328_v26, %v328_v26 }
  0x2e   : > { %v333_v38 = vunpack.c.l.b16 %v207_v21  ;;  %549 = vrot.lane.b32.xlu0 %v2049_v35, %s1857_s28  ;;  %v445_v42 = vor.u32 %v444_v31, %v440_v14  ;;  %v432_v43 = vrot.slane %v430_v33, 1  ;;  %v488_v44 = vshrl.u32 %v2037_v27, 16  ;;  %v213_v21 = vld [vmem:[%s1940_s27 + $0xa4] sm:$0x1] }
  0x2f   : > { %v449_v46 = vrot.slane %v447_v36, 1  ;;  %v435_v48 = vshll.u32 %v2052_v37, 16  ;;  %v490_v51 = vshll.u32 %v2037_v27, 16  ;;  %v2067_v54 = vsel %vm354_vm0, %v457_v24, %v461_v28 }
  0x30   : > { %v2059_v50 = vpack.c.b16 %v333_v38, %v333_v38  ;;  %v433_v55 = vor.u32 %v432_v43, %v428_v32  ;;  %v332_v56 = vunpack.c.l.b16 %v204_v40  ;;  %v478_v57 = vshll.u32 %v2044_v34, 16  ;;  %v2104_v43 = vld [vmem:[%s1940_s27 + $0x90] sm:$0xff] }
  0x31   : > { %v437_v60 = vrot.slane %v435_v48, 1  ;;  %v492_v63 = vrot.slane %v490_v51, 1  ;;  %v476_v3 = vshrl.u32 %v2044_v34, 16  ;;  %v2077_v6 = vsel %vm354_vm0, %v445_v42, %v449_v46 }
  0x32   : > { %v495_v1 = vshll.u32 %v2059_v50, 16  ;;  %v2079_v9 = vpack.c.b16 %v332_v56, %v332_v56  ;;  %v480_v10 = vrot.slane %v478_v57, 1  ;;  %v331_v11 = vunpack.c.l.b16 %v201_v53 }
  0x33   : > { %v2082_v13 = vsel %vm354_vm0, %v433_v55, %v437_v60  ;;  %v493_v14 = vor.u32 %v492_v63, %v488_v44  ;;  %v464_v17 = vshrl.u32 %v2063_v52, 16  ;;  %v466_v19 = vshll.u32 %v2063_v52, 16  ;;  %v210_v44 = vld [vmem:[%s1940_s27 + $0x98] sm:$0x1] }
  0x34   : > { %v497_v22 = vrot.slane %v495_v1, 1  ;;  %v483_v24 = vshll.u32 %v2079_v9, 16  ;;  %v2093_v26 = vpack.c.b16 %v331_v11, %v331_v11  ;;  %v336_v28 = vunpack.c.l.b16 %v216_v4 }
  0x35   : > { %563 = vrot.lane.b32.xlu2 %v2067_v54, %s1857_s28  ;;  %561 = vrot.lane.b32.xlu1 %v2077_v6, %s1857_s28  ;;  %v481_v31 = vor.u32 %v480_v10, %v476_v3  ;;  %v468_v32 = vrot.slane %v466_v19, 1  ;;  %v526_v33 = vshll.u32 %v2071_v58, 16  ;;  %v335_v42 = vunpack.c.l.b16 %v213_v21 }
  0x36   : > { %559 = vrot.lane.b32.xlu0 %v2082_v13, %s1857_s28  ;;  %v485_v36 = vrot.slane %v483_v24, 1  ;;  %v471_v38 = vshll.u32 %v2093_v26, 16  ;;  %v2101_v40 = vpack.c.b16 %v336_v28, %v336_v28  ;;  %v514_v48 = vshll.u32 %v2087_v20, 16 }
  0x37   : > { %v469_v46 = vor.u32 %v468_v32, %v464_v17  ;;  %v2109_v51 = vsel %vm354_vm0, %v493_v14, %v497_v22  ;;  %v524_v55 = vshrl.u32 %v2071_v58, 16  ;;  %v2112_v56 = vpack.c.b16 %v335_v42, %v335_v42  ;;  %v219_v14 = vld [vmem:[%s1940_s27 + $0xbc] sm:$0x1]  ;;  %v2129_v22 = vld [vmem:[%s1940_s27 + $0xb4] sm:$0xff] }
  0x38   : > { %v473_v53 = vrot.slane %v471_v38, 1  ;;  %v528_v57 = vrot.slane %v526_v33, 1  ;;  %v531_v60 = vshll.u32 %v2101_v40, 16  ;;  %v512_v63 = vshrl.u32 %v2087_v20, 16 }
  0x39   : > { %v334_v1 = vunpack.c.l.b16 %v210_v44  ;;  %v2117_v3 = vsel %vm354_vm0, %v481_v31, %v485_v36  ;;  %v516_v4 = vrot.slane %v514_v48, 1  ;;  %v519_v10 = vshll.u32 %v2112_v56, 16 }
  0x3a   : > { %v502_v11 = vshll.u32 %v2104_v43, 16  ;;  %v2123_v17 = vsel %vm354_vm0, %v469_v46, %v473_v53  ;;  %v500_v21 = vshrl.u32 %v2104_v43, 16  ;;  %v529_v28 = vor.u32 %v528_v57, %v524_v55 }
  0x3b   : > { %v2125_v19 = vpack.c.b16 %v334_v1, %v334_v1  ;;  %v533_v31 = vrot.slane %v531_v60, 1  ;;  %v337_v33 = vunpack.c.l.b16 %v219_v14  ;;  %v517_v36 = vor.u32 %v516_v4, %v512_v63 }
  0x3c   : > { %v504_v24 = vrot.slane %v502_v11, 1  ;;  %v521_v38 = vrot.slane %v519_v10, 1  ;;  %v538_v48 = vshll.u32 %v2129_v22, 16  ;;  %v536_v60 = vshrl.u32 %v2129_v22, 16 }
  0x3d   : > { %569 = vrot.lane.b32.xlu2 %v2109_v51, %s1857_s28  ;;  %567 = vrot.lane.b32.xlu1 %v2117_v3, %s1857_s28  ;;  %v507_v32 = vshll.u32 %v2125_v19, 16  ;;  %v2138_v46 = vpack.c.b16 %v337_v33, %v337_v33  ;;  %v2142_v53 = vsel %vm354_vm0, %v529_v28, %v533_v31  ;;  %v583_v4 = vrot.slane %v1983_v39, 1 }
  0x3e   : > { %565 = vrot.lane.b32.xlu0 %v2123_v17, %s1857_s28  ;;  %v505_v42 = vor.u32 %v504_v24, %v500_v21  ;;  %v2145_v55 = vsel %vm354_vm0, %v517_v36, %v521_v38  ;;  %v540_v1 = vrot.slane %v538_v48, 1  ;;  %v584_v10 = vrot.slane %v2016_v62, 1 }
  0x3f   : > { %v509_v44 = vrot.slane %v507_v32, 1  ;;  %v543_v63 = vshll.u32 %v2138_v46, 16  ;;  %v580_v11 = vrot.slane %v1951_v5, 1  ;;  %v581_v14 = vrot.slane %v1969_v23, 1 }
  0x40   : > { %v541_v21 = vor.u32 %v540_v1, %v536_v60  ;;  %v585_v28 = vsel %vm579_vm1, %v583_v4, %v584_v10  ;;  %v592_v62 = vrot.slane %v1943_v0, 1  ;;  %v593_v33 = vrot.slane %v1958_v12, 1 }
  0x41   : > { %v2148_v57 = vsel %vm354_vm0, %v505_v42, %v509_v44  ;;  %v545_v24 = vrot.slane %v543_v63, 1  ;;  %v582_v31 = vsel %vm579_vm1, %v580_v11, %v581_v14  ;;  %v589_v23 = vrot.slane %v1977_v30, 1 }
  0x42   : > { %v590_v36 = vrot.slane %v1999_v49, 1  ;;  %v586_v38 = vrot.slane %v1947_v2, 1  ;;  %v587_v42 = vrot.slane %v1965_v18, 1  ;;  %v2178_v44 = vsel %vm579_vm1, %v592_v62, %v593_v33 }
  0x43   : > { %v2165_v32 = vsel %vm354_vm0, %v541_v21, %v545_v24  ;;  %v601_v12 = vrot.slane %v2010_v59, 1  ;;  %v602_v49 = vrot.slane %v2034_v25, 1  ;;  %v598_v18 = vrot.slane %v2023_v8, 1 }
  0x44   : > { %v2181_v48 = vsel %vm579_vm1, %v589_v23, %v590_v36  ;;  %v588_v60 = vsel %vm579_vm1, %v586_v38, %v587_v42  ;;  %v599_v1 = vrot.slane %v2052_v37, 1  ;;  %v595_v63 = vrot.slane %v1963_v16, 1 }
  0x45   : > { %575 = vrot.lane.b32.xlu2 %v2142_v53, %s1857_s28  ;;  %573 = vrot.lane.b32.xlu1 %v2145_v55, %s1857_s28  ;;  %v596_v4 = vrot.slane %v1974_v29, 1  ;;  %v2196_v10 = vsel %vm579_vm1, %v601_v12, %v602_v49  ;;  %v610_v25 = vrot.slane %v2044_v34, 1  ;;  %v611_v37 = vrot.slane %v2079_v9, 1 }
  0x46   : > { %571 = vrot.lane.b32.xlu0 %v2148_v57, %s1857_s28  ;;  %v2199_v11 = vsel %vm579_vm1, %v598_v18, %v599_v1  ;;  %v607_v29 = vrot.slane %v2063_v52, 1  ;;  %v608_v21 = vrot.slane %v2093_v26, 1  ;;  %v604_v24 = vrot.slane %v1991_v45, 1 }
  0x47   : > { %v2202_v14 = vsel %vm579_vm1, %v595_v63, %v596_v4  ;;  %v2217_v62 = vsel %vm579_vm1, %v610_v25, %v611_v37  ;;  %v619_v9 = vrot.slane %v2087_v20, 1  ;;  %v620_v26 = vrot.slane %v2112_v56, 1 }
  0x48   : > { %v2220_v33 = vsel %vm579_vm1, %v607_v29, %v608_v21  ;;  %v617_v36 = vrot.slane %v2125_v19, 1  ;;  %v613_v38 = vrot.slane %v2037_v27, 1  ;;  %v614_v42 = vrot.slane %v2059_v50, 1 }
  0x49   : > { %v2238_v12 = vsel %vm579_vm1, %v619_v9, %v620_v26 }
  0x4a   : > { %v2244_v18 = vsel %vm579_vm1, %v613_v38, %v614_v42 }
  0x4d   : > { %630 = vrot.lane.b32.xlu2 %v585_v28, %s1858_s29  ;;  %628 = vrot.lane.b32.xlu1 %v582_v31, %s1858_s29  ;;  %v605_v31 = vrot.slane %v2020_v7, 1  ;;  %v616_v7 = vrot.slane %v2104_v43, 1 }
  0x4e   : > { %577 = vrot.lane.b32.xlu0 %v2165_v32, %s1857_s28 }
  0x4f   : > { %v2223_v23 = vsel %vm579_vm1, %v604_v24, %v605_v31  ;;  %v2241_v49 = vsel %vm579_vm1, %v616_v7, %v617_v36 }
  0x55   : > { %636 = vrot.lane.b32.xlu2 %v2178_v44, %s1858_s29  ;;  %634 = vrot.lane.b32.xlu1 %v2181_v48, %s1858_s29 }
  0x56   : > { %632 = vrot.lane.b32.xlu0 %v588_v60, %s1858_s29 }
  0x5d   : > { %642 = vrot.lane.b32.xlu2 %v2196_v10, %s1858_s29  ;;  %640 = vrot.lane.b32.xlu1 %v2199_v11, %s1858_s29 }
  0x5e   : > { %638 = vrot.lane.b32.xlu0 %v2202_v14, %s1858_s29 }
  0x65   : > { %648 = vrot.lane.b32.xlu2 %v2217_v62, %s1858_s29  ;;  %646 = vrot.lane.b32.xlu1 %v2220_v33, %s1858_s29 }
  0x66   : > { %644 = vrot.lane.b32.xlu0 %v2223_v23, %s1858_s29 }
  0x6d   : > { %654 = vrot.lane.b32.xlu2 %v2238_v12, %s1858_s29  ;;  %652 = vrot.lane.b32.xlu1 %v2241_v49, %s1858_s29 }
  0x6e   : > { %650 = vrot.lane.b32.xlu0 %v2244_v18, %s1858_s29 }
  0x75   : > { %747 = vrot.lane.b32.xlu2 %v585_v28, %s1859_s30  ;;  %712 = vrot.lane.b32.xlu1 %v2049_v35, %s1860_s3 }
  0x76   : > { %665 = vrot.lane.b32.xlu0 %v1983_v39, %s1861_s4 }
  0x7d   : > { %866 = vrot.lane.b32.xlu2 %v588_v60, %s1862_s5  ;;  %831 = vrot.lane.b32.xlu1 %v1997_v47, %s1863_s6 }
  0x7e   : > { %784 = vrot.lane.b32.xlu0 %v1947_v2, %s1864_s7 }
  0x7f   : > { %v556_v50 = vpop.permute.xlu2 %555 }
  0x80   : > { %v908_v24 = vsel %vm898_vm3, %v1943_v0, %v556_v50 }
  0x85   : > { %714 = vrot.lane.b32.xlu2 %v1997_v47, %s1860_s3  ;;  %673 = vrot.lane.b32.xlu1 %v1963_v16, %s1861_s4 }
  0x86   : > { %667 = vrot.lane.b32.xlu0 %v1947_v2, %s1861_s4 }
  0x87   : > { %v2268_v35 = vpop.permute.xlu2 %557 }
  0x8d   : > { %755 = vrot.lane.b32.xlu2 %v2202_v14, %s1859_s30  ;;  %749 = vrot.lane.b32.xlu1 %v588_v60, %s1859_s30 }
  0x8e   : > { %720 = vrot.lane.b32.xlu0 %v2014_v61, %s1860_s3 }
  0x8f   : > { %v2275_v56 = vpop.permute.xlu2 %563 }
  0x95   : > { %833 = vrot.lane.b32.xlu2 %v2029_v15, %s1863_s6  ;;  %792 = vrot.lane.b32.xlu1 %v2023_v8, %s1864_s7 }
  0x96   : > { %786 = vrot.lane.b32.xlu0 %v1977_v30, %s1864_s7 }
  0x97   : > { %v2283_v47 = vpop.permute.xlu2 %569  ;;  %v552_v19 = vpop.permute.xlu1 %551 }
  0x98   : > { %v2285_v28 = vpop.permute.xlu0 %547 }
  0x9d   : > { %874 = vrot.lane.b32.xlu2 %v2199_v11, %s1862_s5  ;;  %868 = vrot.lane.b32.xlu1 %v2181_v48, %s1862_s5 }
  0x9e   : > { %839 = vrot.lane.b32.xlu0 %v2082_v13, %s1863_s6 }
  0x9f   : > { %v2293_v60 = vpop.permute.xlu2 %575  ;;  %v554_v1 = vpop.permute.xlu1 %553 }
  0xa0   : > { %v550_v63 = vpop.permute.xlu0 %549 }
  0xa1   : > { %v902_v4 = vsel %vm898_vm3, %v1983_v39, %v550_v63 }
  0xa5   : > { %763 = vrot.lane.b32.xlu2 %v2220_v33, %s1859_s30  ;;  %728 = vrot.lane.b32.xlu1 %v2123_v17, %s1860_s3 }
  0xa6   : > { %681 = vrot.lane.b32.xlu0 %v2063_v52, %s1861_s4 }
  0xa7   : > { %v631_v25 = vpop.permute.xlu2 %630  ;;  %v562_v37 = vpop.permute.xlu1 %561 }
  0xa8   : > { %v2304_v29 = vsel %vm931_vm2, %v902_v4, %v631_v25  ;;  %v560_v21 = vpop.permute.xlu0 %559  ;;  %v914_v7 = vsel %vm898_vm3, %v2010_v59, %v562_v37 }
  0xad   : > { %882 = vrot.lane.b32.xlu2 %v2217_v62, %s1862_s5  ;;  %847 = vrot.lane.b32.xlu1 %v2117_v3, %s1863_s6 }
  0xae   : > { %800 = vrot.lane.b32.xlu0 %v2044_v34, %s1864_s7 }
  0xaf   : > { %v637_v39 = vpop.permute.xlu2 %636  ;;  %v568_v31 = vpop.permute.xlu1 %567 }
  0xb0   : > { %v2315_v9 = vsel %vm931_vm2, %v908_v24, %v637_v39  ;;  %v2317_v26 = vpop.permute.xlu0 %565 }
  0xb5   : > { %716 = vrot.lane.b32.xlu2 %v2029_v15, %s1860_s3  ;;  %675 = vrot.lane.b32.xlu1 %v2023_v8, %s1861_s4  ;;  %v920_v15 = vsel %vm898_vm3, %v2044_v34, %v568_v31  ;;  %v906_v31 = vsel %vm898_vm3, %v1977_v30, %v554_v1 }
  0xb6   : > { %669 = vrot.lane.b32.xlu0 %v1977_v30, %s1861_s4  ;;  %v1702_v30 = vld [vmem:[%s2804_s1 + $0x8] sm:$0xff] }
  0xb7   : > { %v643_v36 = vpop.permute.xlu2 %642  ;;  %v574_v38 = vpop.permute.xlu1 %573 }
  0xb8   : > { %v2328_v42 = vsel %vm931_vm2, %v914_v7, %v643_v36  ;;  %v2330_v50 = vpop.permute.xlu0 %571 }
  0xbd   : > { %757 = vrot.lane.b32.xlu2 %v2199_v11, %s1859_s30  ;;  %751 = vrot.lane.b32.xlu1 %v2181_v48, %s1859_s30  ;;  %v1166_v11 = vld [vmem:[%s2804_s1 + $0x10] sm:$0x3] }
  0xbe   : > { %722 = vrot.lane.b32.xlu0 %v2082_v13, %s1860_s3  ;;  %v1176_v48 = vunpack.c.l.b16 %v1166_v11  ;;  %v926_v13 = vsel %vm898_vm3, %v2087_v20, %v574_v38 }
  0xbf   : > { %v649_v63 = vpop.permute.xlu2 %648  ;;  %v2343_v25 = vpop.permute.xlu1 %628 }
  0xc0   : > { %v2341_v4 = vsel %vm931_vm2, %v920_v15, %v649_v63  ;;  %v2345_v37 = vpop.permute.xlu0 %577  ;;  %v1179_v39 = vpack.c.b16 %v1176_v48, %v1176_v48  ;;  %v904_v15 = vsel %vm898_vm3, %v1947_v2, %v552_v19  ;;  %v912_v19 = vsel %vm898_vm3, %v2023_v8, %v560_v21  ;;  %v1701_v48 = vld [vmem:[%s2804_s1] sm:$0xff] }
  0xc1   : > { %2808 = vst [vmem:[#allocation5_spill] sm:$0xff] %v2345_v37 }
  0xc2   : > { %v1217_v11 = vsel %vm1215_vm4, %v1179_v39, 0 }
  0xc3   : > { %1224 = vmatpush.bf16.msra.mxu0 %v1217_v11  ;;  %1703 = vmatpush.bf16.msra.mxu1 %v1217_v11 }
  0xc4   : > { %1704 = vmatpush.bf16.msra.mxu2 %v1217_v11  ;;  %1705 = vmatpush.bf16.msra.mxu3 %v1217_v11  ;;  %v922_v11 = vsel %vm898_vm3, %v2037_v27, %v2283_v47 }
  0xc5   : > { %835 = vrot.lane.b32.xlu2 %v1987_v41, %s1863_s6  ;;  %794 = vrot.lane.b32.xlu1 %v2010_v59, %s1864_s7 }
  0xc6   : > { %788 = vrot.lane.b32.xlu0 %v1943_v0, %s1864_s7 }
  0xc7   : > { %v655_v24 = vpop.permute.xlu2 %654  ;;  %v635_v36 = vpop.permute.xlu1 %634  ;;  %1225 = vmatpush.bf16.msra.mxu0 %v1702_v30  ;;  %1706 = vmatpush.bf16.msra.mxu1 %v1702_v30 }
  0xc8   : > { %v2361_v7 = vsel %vm931_vm2, %v926_v13, %v655_v24  ;;  %v2366_v63 = vsel %vm931_vm2, %v906_v31, %v635_v36  ;;  %v633_v38 = vpop.permute.xlu0 %632  ;;  %1707 = vmatpush.bf16.msra.mxu2 %v1702_v30  ;;  %1708 = vmatpush.bf16.msra.mxu3 %v1702_v30  ;;  %v910_v13 = vsel %vm898_vm3, %v1963_v16, %v2268_v35 }
  0xc9   : > { %v2369_v37 = vsel %vm931_vm2, %v904_v15, %v633_v38  ;;  %v918_v35 = vsel %vm898_vm3, %v2063_v52, %v2317_v26  ;;  %v916_v36 = vsel %vm898_vm3, %v1991_v45, %v2275_v56  ;;  %v924_v56 = vsel %vm898_vm3, %v2104_v43, %v2330_v50 }
  0xca   : > { %v623_v50 = vrot.slane %v2101_v40, 1 }
  0xcb   : > { %1226 = vmatpush.bf16.msra.mxu0 %v1701_v48  ;;  %1709 = vmatpush.bf16.msra.mxu1 %v1701_v48 }
  0xcc   : > { %1710 = vmatpush.bf16.msra.mxu2 %v1701_v48  ;;  %1711 = vmatpush.bf16.msra.mxu3 %v1701_v48 }
  0xcd   : > { %876 = vrot.lane.b32.xlu2 %v2196_v10, %s1862_s5  ;;  %870 = vrot.lane.b32.xlu1 %v2178_v44, %s1862_s5 }
  0xce   : > { %841 = vrot.lane.b32.xlu0 %v2077_v6, %s1863_s6 }
  0xcf   : > { %v748_v2 = vpop.permute.xlu2 %747  ;;  %v641_v1 = vpop.permute.xlu1 %640 }
  0xd0   : > { %v2389_v24 = vsel %vm931_vm2, %v912_v19, %v641_v1  ;;  %v639_v39 = vpop.permute.xlu0 %638 }
  0xd1   : > { %v2392_v31 = vsel %vm931_vm2, %v910_v13, %v639_v39  ;;  %v900_v13 = vsel %vm898_vm3, %v1951_v5, %v2285_v28 }
  0xd5   : > { %730 = vrot.lane.b32.xlu2 %v2117_v3, %s1860_s3  ;;  %689 = vrot.lane.b32.xlu1 %v2087_v20, %s1861_s4 }
  0xd6   : > { %683 = vrot.lane.b32.xlu0 %v2044_v34, %s1861_s4 }
  0xd7   : > { %v867_v8 = vpop.permute.xlu2 %866  ;;  %v647_v21 = vpop.permute.xlu1 %646 }
  0xd8   : > { %v2407_v15 = vsel %vm931_vm2, %v918_v35, %v647_v21  ;;  %v645_v3 = vpop.permute.xlu0 %644  ;;  %v933_v35 = vsel %vm931_vm2, %v900_v13, %v2343_v25 }
  0xd9   : > { %v2410_v38 = vsel %vm931_vm2, %v916_v36, %v645_v3 }
  0xdd   : > { %771 = vrot.lane.b32.xlu2 %v2238_v12, %s1859_s30  ;;  %765 = vrot.lane.b32.xlu1 %v2217_v62, %s1859_s30  ;;  %v622_v62 = vrot.slane %v2071_v58, 1 }
  0xde   : > { %736 = vrot.lane.b32.xlu0 %v2145_v55, %s1860_s3 }
  0xdf   : > { %v715_v34 = vpop.permute.xlu2 %714  ;;  %v653_v26 = vpop.permute.xlu1 %652  ;;  %v2444_v21 = vsel %vm579_vm1, %v622_v62, %v623_v50 }
  0xe0   : > { %v2425_v30 = vsel %vm931_vm2, %v924_v56, %v653_v26  ;;  %v651_v19 = vpop.permute.xlu0 %650 }
  0xe1   : > { %v2428_v1 = vsel %vm931_vm2, %v922_v11, %v651_v19 }
  0xe5   : > { %849 = vrot.lane.b32.xlu2 %v2109_v51, %s1863_s6  ;;  %808 = vrot.lane.b32.xlu1 %v2071_v58, %s1864_s7 }
  0xe6   : > { %802 = vrot.lane.b32.xlu0 %v2037_v27, %s1864_s7 }
  0xe7   : > { %v756_v47 = vpop.permute.xlu2 %755  ;;  %v713_v48 = vpop.permute.xlu1 %712 }
  0xe8   : > { %v666_v39 = vpop.permute.xlu0 %665 }
  0xe9   : > { %v966_v36 = vsel %vm964_vm5, %v933_v35, %v666_v39 }
  0xea   : > { %v999_v40 = vsel %vm997_vm6, %v966_v36, %v713_v48 }
  0xeb   : > { %v1032_v25 = vsel %vm1030_vm7, %v999_v40, %v748_v2 }
  0xed   : > { %890 = vrot.lane.b32.xlu2 %v2444_v21, %s1862_s5  ;;  %884 = vrot.lane.b32.xlu1 %v2244_v18, %s1862_s5 }
  0xee   : > { %855 = vrot.lane.b32.xlu0 %v2142_v53, %s1863_s6 }
  0xef   : > { %v834_v5 = vpop.permute.xlu2 %833  ;;  %v832_v28 = vpop.permute.xlu1 %831 }
  0xf0   : > { %v785_v3 = vpop.permute.xlu0 %784 }
  0xf1   : > { %v1065_v56 = vsel %vm1063_vm8, %v1032_v25, %v785_v3 }
  0xf2   : > { %v1098_v26 = vsel %vm1096_vm9, %v1065_v56, %v832_v28 }
  0xf3   : > { %v1131_v11 = vsel %vm1129_vm10, %v1098_v26, %v867_v8 }
  0xf4   : > { %1663 = vmatmul.msk.bf16.vlgmr.msra.gmra.mxu0 %vm1182_vm11, %v1131_v11 }
  0xf5   : > { %718 = vrot.lane.b32.xlu2 %v1987_v41, %s1860_s3  ;;  %677 = vrot.lane.b32.xlu1 %v2010_v59, %s1861_s4 }
  0xf6   : > { %671 = vrot.lane.b32.xlu0 %v1943_v0, %s1861_s4 }
  0xf7   : > { %v875_v2 = vpop.permute.xlu2 %874  ;;  %v674_v19 = vpop.permute.xlu1 %673 }
  0xf8   : > { %v668_v62 = vpop.permute.xlu0 %667  ;;  %v974_v48 = vsel %vm964_vm5, %v2315_v9, %v674_v19 }
  0xf9   : > { %v968_v59 = vsel %vm964_vm5, %v2304_v29, %v668_v62 }
  0xfd   : > { %759 = vrot.lane.b32.xlu2 %v2196_v10, %s1859_s30  ;;  %753 = vrot.lane.b32.xlu1 %v2178_v44, %s1859_s30 }
  0xfe   : > { %724 = vrot.lane.b32.xlu0 %v2077_v6, %s1860_s3  ;;  %v1001_v6 = vsel %vm997_vm6, %v968_v59, %v715_v34 }
  0xff   : > { %v764_v8 = vpop.permute.xlu2 %763  ;;  %v750_v41 = vpop.permute.xlu1 %749 }
 0x100   : > { %v721_v50 = vpop.permute.xlu0 %720  ;;  %v1034_v13 = vsel %vm1030_vm7, %v1001_v6, %v750_v41 }
 0x105   : > { %837 = vrot.lane.b32.xlu2 %v2014_v61, %s1863_s6  ;;  %796 = vrot.lane.b32.xlu1 %v1991_v45, %s1864_s7  ;;  %v1007_v61 = vsel %vm997_vm6, %v974_v48, %v721_v50 }
 0x106   : > { %790 = vrot.lane.b32.xlu0 %v1963_v16, %s1864_s7  ;;  %v1040_v29 = vsel %vm1030_vm7, %v1007_v61, %v756_v47 }
 0x107   : > { %v883_v0 = vpop.permute.xlu2 %882  ;;  %v793_v44 = vpop.permute.xlu1 %792 }
 0x108   : > { %v787_v10 = vpop.permute.xlu0 %786  ;;  %v1073_v35 = vsel %vm1063_vm8, %v1040_v29, %v793_v44 }
 0x109   : > { %v1067_v39 = vsel %vm1063_vm8, %v1034_v13, %v787_v10 }
 0x10a   : > { %v1100_v9 = vsel %vm1096_vm9, %v1067_v39, %v834_v5 }
 0x10d   : > { %878 = vrot.lane.b32.xlu2 %v2223_v23, %s1862_s5  ;;  %872 = vrot.lane.b32.xlu1 %v2202_v14, %s1862_s5 }
 0x10e   : > { %843 = vrot.lane.b32.xlu0 %v2067_v54, %s1863_s6 }
 0x10f   : > { %v717_v16 = vpop.permute.xlu2 %716  ;;  %v869_v34 = vpop.permute.xlu1 %868 }
 0x110   : > { %v840_v36 = vpop.permute.xlu0 %839  ;;  %v1133_v40 = vsel %vm1129_vm10, %v1100_v9, %v869_v34 }
 0x111   : > { %v1106_v28 = vsel %vm1096_vm9, %v1073_v35, %v840_v36  ;;  %1664 = vmatmul.msk.bf16.gmra.mxu0 %vm1182_vm11, %v1133_v40  ;;  %v222_v35 = vld [vmem:[%s1940_s27 + $0xc8] sm:$0x1]  ;;  %v1699_v40 = vld [vmem:[%s1940_s27 + $0xc0] sm:$0xff] }
 0x112   : > { %v1139_v14 = vsel %vm1129_vm10, %v1106_v28, %v875_v2  ;;  %v698_v28 = vunpack.c.l.b16 %v222_v35 }
 0x113   : > { %1667 = vmatmul.msk.bf16.vlgmr.msra.gmra.mxu1 %vm1182_vm11, %v1139_v14 }
 0x114   : > { %v699_v14 = vpack.c.b16 %v698_v28, %v698_v28 }
 0x115   : > { %732 = vrot.lane.b32.xlu2 %v2109_v51, %s1860_s3  ;;  %691 = vrot.lane.b32.xlu1 %v2071_v58, %s1861_s4 }
 0x116   : > { %685 = vrot.lane.b32.xlu0 %v2037_v27, %s1861_s4 }
 0x117   : > { %v758_v47 = vpop.permute.xlu2 %757  ;;  %v729_v5 = vpop.permute.xlu1 %728 }
 0x118   : > { %v682_v25 = vpop.permute.xlu0 %681 }
 0x119   : > { %v982_v3 = vsel %vm964_vm5, %v2410_v38, %v682_v25  ;;  %v701_v25 = vshrl.u32 %v1699_v40, 16 }
 0x11a   : > { %v1015_v56 = vsel %vm997_vm6, %v982_v3, %v729_v5 }
 0x11b   : > { %v1048_v27 = vsel %vm1030_vm7, %v1015_v56, %v764_v8  ;;  %v708_v56 = vshll.u32 %v699_v14, 16 }
 0x11d   : > { %773 = vrot.lane.b32.xlu2 %v2444_v21, %s1859_s30  ;;  %767 = vrot.lane.b32.xlu1 %v2244_v18, %s1859_s30  ;;  %v626_v18 = vrot.slane %v2138_v46, 1 }
 0x11e   : > { %738 = vrot.lane.b32.xlu0 %v2142_v53, %s1860_s3  ;;  %v625_v53 = vrot.slane %v2129_v22, 1 }
 0x11f   : > { %v836_v58 = vpop.permute.xlu2 %835  ;;  %v848_v51 = vpop.permute.xlu1 %847 }
 0x120   : > { %v801_v26 = vpop.permute.xlu0 %800  ;;  %v2528_v41 = vsel %vm579_vm1, %v625_v53, %v626_v18 }
 0x121   : > { %v1081_v11 = vsel %vm1063_vm8, %v1048_v27, %v801_v26 }
 0x122   : > { %v1114_v38 = vsel %vm1096_vm9, %v1081_v11, %v848_v51 }
 0x123   : > { %v1147_v2 = vsel %vm1129_vm10, %v1114_v38, %v883_v0 }
 0x124   : > { %1671 = vmatmul.msk.bf16.vlgmr.msra.gmra.mxu2 %vm1182_vm11, %v1147_v2 }
 0x125   : > { %851 = vrot.lane.b32.xlu2 %v2148_v57, %s1863_s6  ;;  %810 = vrot.lane.b32.xlu1 %v2129_v22, %s1864_s7 }
 0x126   : > { %804 = vrot.lane.b32.xlu0 %v2104_v43, %s1864_s7 }
 0x127   : > { %v877_v19 = vpop.permute.xlu2 %876  ;;  %v676_v62 = vpop.permute.xlu1 %675 }
 0x128   : > { %v670_v8 = vpop.permute.xlu0 %669  ;;  %v976_v13 = vsel %vm964_vm5, %v2392_v31, %v676_v62  ;;  %v745_v62 = vrot.slane %v699_v14, 1 }
 0x129   : > { %v970_v44 = vsel %vm964_vm5, %v2369_v37, %v670_v8 }
 0x12a   : > { %v1003_v48 = vsel %vm997_vm6, %v970_v44, %v717_v16 }
 0x12d   : > { %892 = vrot.lane.b32.xlu2 %v2528_v41, %s1862_s5  ;;  %886 = vrot.lane.b32.xlu1 %v2241_v49, %s1862_s5 }
 0x12e   : > { %857 = vrot.lane.b32.xlu0 %v2165_v32, %s1863_s6 }
 0x12f   : > { %v731_v50 = vpop.permute.xlu2 %730  ;;  %v752_v46 = vpop.permute.xlu1 %751 }
 0x130   : > { %v723_v0 = vpop.permute.xlu0 %722  ;;  %v1036_v61 = vsel %vm1030_vm7, %v1003_v48, %v752_v46 }
 0x135   : > { %761 = vrot.lane.b32.xlu2 %v2223_v23, %s1859_s30  ;;  %726 = vrot.lane.b32.xlu1 %v2067_v54, %s1860_s3  ;;  %v1009_v23 = vsel %vm997_vm6, %v976_v13, %v723_v0  ;;  %v225_v0 = vld [vmem:[%s1940_s27 + $0xd4] sm:$0x1] }
 0x136   : > { %679 = vrot.lane.b32.xlu0 %v1991_v45, %s1861_s4  ;;  %v1042_v37 = vsel %vm1030_vm7, %v1009_v23, %v758_v47 }
 0x137   : > { %v772_v59 = vpop.permute.xlu2 %771  ;;  %v795_v10 = vpop.permute.xlu1 %794 }
 0x138   : > { %v789_v6 = vpop.permute.xlu0 %788  ;;  %v1075_v16 = vsel %vm1063_vm8, %v1042_v37, %v795_v10  ;;  %v1700_v10 = vld [vmem:[%s1940_s27 + $0xcc] sm:$0xff] }
 0x139   : > { %v1069_v54 = vsel %vm1063_vm8, %v1036_v61, %v789_v6  ;;  %v817_v6 = vunpack.c.l.b16 %v225_v0  ;;  %v822_v61 = vshll.u32 %v1700_v10, 16 }
 0x13a   : > { %v1102_v31 = vsel %vm1096_vm9, %v1069_v54, %v836_v58  ;;  %v820_v54 = vshrl.u32 %v1700_v10, 16 }
 0x13b   : > { %v818_v13 = vpack.c.b16 %v817_v6, %v817_v6 }
 0x13d   : > { %880 = vrot.lane.b32.xlu2 %v2220_v33, %s1862_s5  ;;  %845 = vrot.lane.b32.xlu1 %v2123_v17, %s1863_s6  ;;  %v827_v37 = vshll.u32 %v818_v13, 16 }
 0x13e   : > { %798 = vrot.lane.b32.xlu0 %v2063_v52, %s1864_s7 }
 0x13f   : > { %v850_v45 = vpop.permute.xlu2 %849  ;;  %v871_v39 = vpop.permute.xlu1 %870 }
 0x140   : > { %v842_v29 = vpop.permute.xlu0 %841  ;;  %v1135_v9 = vsel %vm1129_vm10, %v1102_v31, %v871_v39  ;;  %v863_v39 = vrot.slane %v1700_v10, 1 }
 0x141   : > { %v1108_v33 = vsel %vm1096_vm9, %v1075_v16, %v842_v29  ;;  %1665 = vmatmul.msk.bf16.gmra.mxu0 %vm1182_vm11, %v1135_v9  ;;  %v864_v16 = vrot.slane %v818_v13, 1  ;;  %v829_v9 = vrot.slane %v827_v37, 1 }
 0x142   : > { %v1141_v17 = vsel %vm1129_vm10, %v1108_v33, %v877_v19  ;;  %v744_v19 = vrot.slane %v1699_v40, 1 }
 0x143   : > { %1668 = vmatmul.msk.bf16.gmra.mxu1 %vm1182_vm11, %v1141_v17  ;;  %v865_v17 = vsel %vm579_vm1, %v863_v39, %v864_v16 }
 0x145   : > { %693 = vrot.lane.b32.xlu2 %v2129_v22, %s1861_s4  ;;  %687 = vrot.lane.b32.xlu1 %v2104_v43, %s1861_s4  ;;  %v703_v43 = vshll.u32 %v1699_v40, 16 }
 0x146   : > { %656 = vrot.lane.b32.xlu0 %v2444_v21, %s1858_s29 }
 0x147   : > { %v891_v52 = vpop.permute.xlu2 %890  ;;  %v690_v34 = vpop.permute.xlu1 %689  ;;  %v705_v3 = vrot.slane %v703_v43, 1 }
 0x148   : > { %v684_v36 = vpop.permute.xlu0 %683  ;;  %v990_v38 = vsel %vm964_vm5, %v2425_v30, %v690_v34 }
 0x14d   : > { %769 = vrot.lane.b32.xlu2 %v2241_v49, %s1859_s30  ;;  %740 = vrot.lane.b32.xlu1 %v2165_v32, %s1860_s3  ;;  %v706_v32 = vor.u32 %v705_v3, %v701_v25  ;;  %v710_v49 = vrot.slane %v708_v56, 1 }
 0x14e   : > { %734 = vrot.lane.b32.xlu0 %v2148_v57, %s1860_s3  ;;  %v984_v57 = vsel %vm964_vm5, %v2407_v15, %v684_v36 }
 0x14f   : > { %v2578_v47 = vpop.permute.xlu2 %718  ;;  %v766_v21 = vpop.permute.xlu1 %765  ;;  %v1017_v26 = vsel %vm997_vm6, %v984_v57, %v731_v50  ;;  %v711_v11 = vsel %vm354_vm0, %v706_v32, %v710_v49 }
 0x150   : > { %v737_v5 = vpop.permute.xlu0 %736 }
 0x151   : > { %v1023_v2 = vsel %vm997_vm6, %v990_v38, %v737_v5 }
 0x152   : > { %v1056_v15 = vsel %vm1030_vm7, %v1023_v2, %v772_v59  ;;  %v746_v59 = vsel %vm579_vm1, %v744_v19, %v745_v62 }
 0x155   : > { %812 = vrot.lane.b32.xlu2 %v1699_v40, %s1864_s7  ;;  %806 = vrot.lane.b32.xlu1 %v2087_v20, %s1864_s7  ;;  %v1050_v20 = vsel %vm1030_vm7, %v1017_v26, %v766_v21 }
 0x156   : > { %775 = vrot.lane.b32.xlu0 %v2528_v41, %s1859_s30 }
 0x157   : > { %v809_v58 = vpop.permute.xlu1 %808  ;;  %v760_v51 = vpop.permute.xlu2 %759 }
 0x158   : > { %v803_v27 = vpop.permute.xlu0 %802  ;;  %v1089_v8 = vsel %vm1063_vm8, %v1056_v15, %v809_v58 }
 0x159   : > { %v1083_v53 = vsel %vm1063_vm8, %v1050_v20, %v803_v27 }
 0x15a   : > { %v1116_v18 = vsel %vm1096_vm9, %v1083_v53, %v850_v45  ;;  %v824_v45 = vrot.slane %v822_v61, 1 }
 0x15d   : > { %888 = vrot.lane.b32.xlu2 %v2238_v12, %s1862_s5  ;;  %859 = vrot.lane.b32.xlu1 %v711_v11, %s1863_s6 }
 0x15e   : > { %853 = vrot.lane.b32.xlu0 %v2145_v55, %s1863_s6 }
 0x15f   : > { %v885_v30 = vpop.permute.xlu1 %884  ;;  %v838_v44 = vpop.permute.xlu2 %837 }
 0x160   : > { %v856_v50 = vpop.permute.xlu0 %855  ;;  %v1149_v46 = vsel %vm1129_vm10, %v1116_v18, %v885_v30 }
 0x161   : > { %v1122_v12 = vsel %vm1096_vm9, %v1089_v8, %v856_v50  ;;  %1672 = vmatmul.msk.bf16.gmra.mxu2 %vm1182_vm11, %v1149_v46 }
 0x162   : > { %v1155_v55 = vsel %vm1129_vm10, %v1122_v12, %v891_v52 }
 0x163   : > { %1675 = vmatmul.msk.bf16.vlgmr.msra.gmra.mxu3 %vm1182_vm11, %v1155_v55 }
 0x165   : > { %695 = vrot.lane.b32.xlu2 %v1699_v40, %s1861_s4  ;;  %658 = vrot.lane.b32.xlu1 %v2528_v41, %s1858_s29  ;;  %v825_v41 = vor.u32 %v824_v45, %v820_v54  ;;  %s1494_s29 = scalar_lea.hbm %s2805_s2, %s1680_s26 }
 0x166   : > { %894 = vrot.lane.b32.xlu0 %v746_v59, %s1862_s5  ;;  %s1498_s4 = sshll.u32 %s1494_s29, 4  ;;  %s1499_s4 = int_to_ptr.hbm [resolvable:$true] %s1498_s4 }
 0x167   : > { %v678_v48 = vpop.permute.xlu1 %677  ;;  %v879_v31 = vpop.permute.xlu2 %878  ;;  %v830_v52 = vsel %vm354_vm0, %v825_v41, %v829_v9 }
 0x168   : > { %v672_v23 = vpop.permute.xlu0 %671  ;;  %v978_v14 = vsel %vm964_vm5, %v2389_v24, %v678_v48 }
 0x169   : > { %v972_v35 = vsel %vm964_vm5, %v2366_v63, %v672_v23 }
 0x16a   : > { %v1005_v28 = vsel %vm997_vm6, %v972_v35, %v2578_v47 }
 0x16d   : > { %814 = vrot.lane.b32.xlu2 %v1700_v10, %s1864_s7  ;;  %777 = vrot.lane.b32.xlu1 %v746_v59, %s1859_s30  ;;  %s160_s30 = scalar_lea.vmem [#allocation2], %s1581_s25 }
 0x16e   : > { %742 = vrot.lane.b32.xlu0 %v711_v11, %s1860_s3  ;;  %s1496_s3 = sshll.u32 %s160_s30, 4  ;;  %s1497_s3 = int_to_ptr.vmem [resolvable:$true] %s1496_s3 }
 0x16f   : > { %v754_v29 = vpop.permute.xlu1 %753  ;;  %v733_v34 = vpop.permute.xlu2 %732 }
 0x170   : > { %v725_v33 = vpop.permute.xlu0 %724  ;;  %v1038_v43 = vsel %vm1030_vm7, %v1005_v28, %v754_v29 }
 0x171   : > { %v1011_v21 = vsel %vm997_vm6, %v978_v14, %v725_v33 }
 0x172   : > { %v1044_v25 = vsel %vm1030_vm7, %v1011_v21, %v760_v51 }
 0x175   : > { %896 = vrot.lane.b32.xlu1 %v865_v17, %s1862_s5  ;;  %s1791_s5 = sshra.s32 %s1499_s4, 4  ;;  %s1792_s5 = int_to_ptr.hbm [resolvable:$true] %s1791_s5 }
 0x176   : > { %861 = vrot.lane.b32.xlu0 %v830_v52, %s1863_s6  ;;  %s1793_s6 = scalar_lea.hbm %s1792_s5, 2  ;;  %p1798_p1 = scmp.lt.s32.totalorder %s1792_s5, %s2805_s2 }
 0x177   : > { %v797_v36 = vpop.permute.xlu1 %796  ;;  %v774_v63 = vpop.permute.xlu2 %773  ;;  %p1794_p12 = scmp.ne.s32.totalorder %s1792_s5, %s1793_s6  ;;  %p1799_p2 = scmp.lt.s32.totalorder %s1797_s15, %s1793_s6 }
 0x178   : > { %v791_v40 = vpop.permute.xlu0 %790  ;;  %v1077_v32 = vsel %vm1063_vm8, %v1044_v25, %v797_v36  ;;  %v1776_v36 = vld [vmem:[%s1940_s27 + $0xa8] sm:$0xff] }
 0x179   : > { %v1071_v5 = vsel %vm1063_vm8, %v1038_v43, %v791_v40  ;;  %v928_v40 = vsel %vm898_vm3, %v1776_v36, %v2293_v60  ;;  %p1795_p13 = pnand %p1794_p12, %p1920_p4  ;;  %p1800_p3 = por %p1799_p2, %p1798_p1 }
 0x17a   : > { %v1104_v3 = vsel %vm1096_vm9, %v1071_v5, %v838_v44 }
 0x17b   : > { %p1796_p0 = pneg %p1795_p13 }
 0x17d   : > { %p1801_p5 = pnand %p1800_p3, %p1796_p0 }
 0x17f   : > { %v873_v56 = vpop.permute.xlu1 %872  ;;  %v852_v51 = vpop.permute.xlu2 %851 }
 0x180   : > { %v844_v49 = vpop.permute.xlu0 %843  ;;  %v1137_v47 = vsel %vm1129_vm10, %v1104_v3, %v873_v56 }
 0x181   : > { %v1110_v57 = vsel %vm1096_vm9, %v1077_v32, %v844_v49  ;;  %1666 = vmatmul.msk.bf16.gmra.mxu0 %vm1182_vm11, %v1137_v47 }
 0x182   : > { %v1143_v24 = vsel %vm1129_vm10, %v1110_v57, %v879_v31 }
 0x183   : > { %1669 = vmatmul.msk.bf16.gmra.mxu1 %vm1182_vm11, %v1143_v24 }
 0x187   : > { %v692_v58 = vpop.permute.xlu1 %691  ;;  %v893_v38 = vpop.permute.xlu2 %892 }
 0x188   : > { %v686_v27 = vpop.permute.xlu0 %685  ;;  %v992_v18 = vsel %vm964_vm5, %v2361_v7, %v692_v58 }
 0x189   : > { %v986_v20 = vsel %vm964_vm5, %v2341_v4, %v686_v27  ;;  %v2809_v27 = vld [vmem:[#allocation5_spill] sm:$0xff] }
 0x18a   : > { %v1019_v15 = vsel %vm997_vm6, %v986_v20, %v733_v34 }
 0x18f   : > { %v768_v26 = vpop.permute.xlu1 %767  ;;  %v762_v8 = vpop.permute.xlu2 %761 }
 0x190   : > { %v739_v11 = vpop.permute.xlu0 %738  ;;  %v1052_v30 = vsel %vm1030_vm7, %v1019_v15, %v768_v26 }
 0x191   : > { %v1025_v19 = vsel %vm997_vm6, %v992_v18, %v739_v11 }
 0x192   : > { %v1058_v50 = vsel %vm1030_vm7, %v1025_v19, %v774_v63 }
 0x197   : > { %v811_v2 = vpop.permute.xlu1 %810  ;;  %v881_v10 = vpop.permute.xlu2 %880 }
 0x198   : > { %v805_v53 = vpop.permute.xlu0 %804  ;;  %v1091_v4 = vsel %vm1063_vm8, %v1058_v50, %v811_v2 }
 0x199   : > { %v1085_v62 = vsel %vm1063_vm8, %v1052_v30, %v805_v53 }
 0x19a   : > { %v1118_v46 = vsel %vm1096_vm9, %v1085_v62, %v852_v51  ;;  %v930_v51 = vsel %vm898_vm3, %v2129_v22, %v2809_v27 }
 0x19f   : > { %v887_v0 = vpop.permute.xlu1 %886  ;;  %v694_v37 = vpop.permute.xlu2 %693 }
 0x1a0   : > { %v858_v12 = vpop.permute.xlu0 %857  ;;  %v1151_v44 = vsel %vm1129_vm10, %v1118_v46, %v887_v0  ;;  %v1248_v0 = vpop.f32.mrf.mxu1 }
 0x1a1   : > { %v1124_v55 = vsel %vm1096_vm9, %v1091_v4, %v858_v12  ;;  %1673 = vmatmul.msk.bf16.gmra.mxu2 %vm1182_vm11, %v1151_v44 }
 0x1a2   : > { %v1157_v7 = vsel %vm1129_vm10, %v1124_v55, %v893_v38  ;;  %v1228_v38 = vpop.f32.mrf.mxu0 }
 0x1a3   : > { %1676 = vmatmul.msk.bf16.gmra.mxu3 %vm1182_vm11, %v1157_v7 }
 0x1a7   : > { %v727_v59 = vpop.permute.xlu1 %726  ;;  %v770_v41 = vpop.permute.xlu2 %769 }
 0x1a8   : > { %v680_v6 = vpop.permute.xlu0 %679  ;;  %v1250_v44 = vpop.f32.mrf.mxu1 }
 0x1a9   : > { %v980_v48 = vsel %vm964_vm5, %v2328_v42, %v680_v6 }
 0x1aa   : > { %v1013_v13 = vsel %vm997_vm6, %v980_v48, %v727_v59  ;;  %v1230_v50 = vpop.f32.mrf.mxu0  ;;  %v1377_v48 = vmul.f32 %v1228_v38, %v1228_v38 }
 0x1ab   : > { %v1046_v23 = vsel %vm1030_vm7, %v1013_v13, %v762_v8  ;;  %v1309_v13 = vsel %vm1129_vm10, %v1230_v50, 0.0 }
 0x1af   : > { %v846_v61 = vpop.permute.xlu1 %845  ;;  %v813_v33 = vpop.permute.xlu2 %812 }
 0x1b0   : > { %v799_v54 = vpop.permute.xlu0 %798 }
 0x1b1   : > { %v1079_v45 = vsel %vm1063_vm8, %v1046_v23, %v799_v54  ;;  %v1308_v23 = vsel %vm1129_vm10, %v1228_v38, 0.0 }
 0x1b2   : > { %v1112_v31 = vsel %vm1096_vm9, %v1079_v45, %v846_v61  ;;  %v1233_v46 = vpop.f32.mrf.mxu0 }
 0x1b3   : > { %v1145_v39 = vsel %vm1129_vm10, %v1112_v31, %v881_v10  ;;  %v1378_v10 = vmul.f32 %v1230_v50, %v1230_v50  ;;  %v1379_v61 = vmul.f32 %v1233_v46, %v1233_v46  ;;  %v1311_v45 = vsel %vm1129_vm10, %v1233_v46, 0.0 }
 0x1b4   : > { %1670 = vmatmul.msk.bf16.gmra.mxu1 %vm1182_vm11, %v1145_v39  ;;  %v1310_v31 = vadd.f32 %v1309_v13, %v1308_v23  ;;  %v1409_v39 = vsel %vm1129_vm10, %v1377_v48, 0.0 }
 0x1b5   : > { %v1410_v54 = vsel %vm1129_vm10, %v1378_v10, 0.0 }
 0x1b7   : > { %v688_v16 = vpop.permute.xlu1 %687  ;;  %v889_v21 = vpop.permute.xlu2 %888 }
 0x1b8   : > { %v657_v29 = vpop.permute.xlu0 %656  ;;  %v988_v34 = vsel %vm964_vm5, %v2428_v1, %v688_v16  ;;  %v1412_v16 = vsel %vm1129_vm10, %v1379_v61, 0.0 }
 0x1b9   : > { %v961_v28 = vsel %vm931_vm2, %v928_v40, %v657_v29 }
 0x1ba   : > { %v994_v56 = vsel %vm964_vm5, %v961_v28, %v694_v37  ;;  %v1235_v4 = vpop.f32.mrf.mxu0 }
 0x1bb   : > { %v1380_v37 = vmul.f32 %v1235_v4, %v1235_v4  ;;  %v1313_v29 = vsel %vm1129_vm10, %v1235_v4, 0.0 }
 0x1bf   : > { %v741_v42 = vpop.permute.xlu1 %740  ;;  %v696_v58 = vpop.permute.xlu2 %695 }
 0x1c0   : > { %v735_v9 = vpop.permute.xlu0 %734  ;;  %v1027_v63 = vsel %vm997_vm6, %v994_v56, %v741_v42  ;;  %v1253_v55 = vpop.f32.mrf.mxu1  ;;  %v1411_v42 = vadd.f32 %v1410_v54, %v1409_v39 }
 0x1c1   : > { %v1021_v35 = vsel %vm997_vm6, %v988_v34, %v735_v9  ;;  %v1312_v9 = vadd.f32 %v1311_v45, %v1310_v31  ;;  %v1327_v4 = vsel %vm1129_vm10, %v1253_v55, 0.0 }
 0x1c2   : > { %v1054_v14 = vsel %vm1030_vm7, %v1021_v35, %v770_v41  ;;  %v1238_v12 = vpop.f32.mrf.mxu0  ;;  %v1413_v35 = vadd.f32 %v1412_v16, %v1411_v42 }
 0x1c3   : > { %v1381_v41 = vmul.f32 %v1238_v12, %v1238_v12  ;;  %v1314_v36 = vadd.f32 %v1313_v29, %v1312_v9 }
 0x1c7   : > { %v807_v17 = vpop.permute.xlu1 %806  ;;  %v815_v18 = vpop.permute.xlu2 %814 }
 0x1c8   : > { %v776_v52 = vpop.permute.xlu0 %775  ;;  %v1087_v5 = vsel %vm1063_vm8, %v1054_v14, %v807_v17  ;;  %v1255_v6 = vpop.f32.mrf.mxu1  ;;  %v1416_v14 = vsel %vm1129_vm10, %v1381_v41, 0.0 }
 0x1c9   : > { %v1060_v60 = vsel %vm1030_vm7, %v1027_v63, %v776_v52  ;;  %v2700_v17 = vpop.f32.mrf.mxu2  ;;  %v1315_v52 = vsel %vm1129_vm10, %v1238_v12, 0.0  ;;  %v1329_v10 = vsel %vm1129_vm10, %v1255_v6, 0.0 }
 0x1ca   : > { %v1093_v32 = vsel %vm1063_vm8, %v1060_v60, %v813_v33  ;;  %v1240_v7 = vpop.f32.mrf.mxu0  ;;  %v1414_v33 = vsel %vm1129_vm10, %v1380_v37, 0.0 }
 0x1cb   : > { %v1382_v34 = vmul.f32 %v1240_v7, %v1240_v7 }
 0x1cf   : > { %v860_v43 = vpop.permute.xlu1 %859 }
 0x1d0   : > { %v854_v25 = vpop.permute.xlu0 %853  ;;  %v1126_v47 = vsel %vm1096_vm9, %v1093_v32, %v860_v43  ;;  %v1317_v43 = vsel %vm1129_vm10, %v1240_v7, 0.0 }
 0x1d1   : > { %v1120_v3 = vsel %vm1096_vm9, %v1087_v5, %v854_v25  ;;  %v1415_v5 = vadd.f32 %v1414_v33, %v1413_v35  ;;  %v1316_v25 = vadd.f32 %v1315_v52, %v1314_v36 }
 0x1d2   : > { %v1153_v1 = vsel %vm1129_vm10, %v1120_v3, %v889_v21  ;;  %v1418_v3 = vsel %vm1129_vm10, %v1382_v34, 0.0 }
 0x1d3   : > { %1674 = vmatmul.msk.bf16.gmra.mxu2 %vm1182_vm11, %v1153_v1  ;;  %v1417_v63 = vadd.f32 %v1416_v14, %v1415_v5  ;;  %v1318_v60 = vadd.f32 %v1317_v43, %v1316_v25  ;;  %v1393_v5 = vmul.f32 %v2700_v17, %v2700_v17 }
 0x1d7   : > { %v659_v49 = vpop.permute.xlu1 %658 }
 0x1d8   : > { %v895_v57 = vpop.permute.xlu0 %894  ;;  %v963_v26 = vsel %vm931_vm2, %v930_v51, %v659_v49  ;;  %v1385_v51 = vmul.f32 %v1248_v0, %v1248_v0 }
 0x1d9   : > { %v1159_v24 = vsel %vm1129_vm10, %v1126_v47, %v895_v57  ;;  %v996_v2 = vsel %vm964_vm5, %v963_v26, %v696_v58  ;;  %v1419_v47 = vadd.f32 %v1418_v3, %v1417_v63  ;;  %v1270_v26 = vpop.f32.mrf.mxu2  ;;  %v1339_v3 = vsel %vm1129_vm10, %v2700_v17, 0.0 }
 0x1da   : > { %1677 = vmatmul.msk.bf16.gmra.mxu3 %vm1182_vm11, %v1159_v24  ;;  %v1394_v63 = vmul.f32 %v1270_v26, %v1270_v26 }
 0x1df   : > { %v778_v11 = vpop.permute.xlu1 %777 }
 0x1e0   : > { %v743_v20 = vpop.permute.xlu0 %742 }
 0x1e1   : > { %v1029_v53 = vsel %vm997_vm6, %v996_v2, %v743_v20  ;;  %v1323_v20 = vsel %vm1129_vm10, %v1248_v0, 0.0  ;;  %v1388_v0 = vmul.f32 %v1255_v6, %v1255_v6 }
 0x1e2   : > { %v1062_v15 = vsel %vm1030_vm7, %v1029_v53, %v778_v11  ;;  %v1424_v53 = vsel %vm1129_vm10, %v1385_v51, 0.0 }
 0x1e3   : > { %v1095_v19 = vsel %vm1063_vm8, %v1062_v15, %v815_v18  ;;  %v1386_v15 = vmul.f32 %v1250_v44, %v1250_v44  ;;  %v1430_v13 = vsel %vm1129_vm10, %v1388_v0, 0.0 }
 0x1e4   : > { %v1273_v50 = vpop.f32.mrf.mxu2 }
 0x1e5   : > { %v1343_v51 = vsel %vm1129_vm10, %v1273_v50, 0.0 }
 0x1e7   : > { %v897_v30 = vpop.permute.xlu1 %896 }
 0x1e8   : > { %v862_v62 = vpop.permute.xlu0 %861 }
 0x1e9   : > { %v1128_v8 = vsel %vm1096_vm9, %v1095_v19, %v862_v62  ;;  %v1426_v62 = vsel %vm1129_vm10, %v1386_v15, 0.0 }
 0x1ea   : > { %v1161_v22 = vsel %vm1129_vm10, %v1128_v8, %v897_v30  ;;  %v1325_v30 = vsel %vm1129_vm10, %v1250_v44, 0.0  ;;  %v1387_v8 = vmul.f32 %v1253_v55, %v1253_v55  ;;  %v2718_v44 = vpop.f32.mrf.mxu3 }
 0x1eb   : > { %1678 = vmatmul.msk.bf16.gmra.mxu3 %vm1182_vm11, %v1161_v22 }
 0x1ec   : > { %v1428_v7 = vsel %vm1129_vm10, %v1387_v8, 0.0  ;;  %v1275_v45 = vpop.f32.mrf.mxu2 }
 0x1ed   : > { %v1396_v17 = vmul.f32 %v1275_v45, %v1275_v45 }
 0x1ef   : > { %v1446_v15 = vsel %vm1129_vm10, %v1396_v17, 0.0 }
 0x1fe   : > { %v1243_v59 = vpop.f32.mrf.mxu0 }
 0x1ff   : > { %v1383_v21 = vmul.f32 %v1243_v59, %v1243_v59  ;;  %v1319_v56 = vsel %vm1129_vm10, %v1243_v59, 0.0 }
 0x200   : > { %v1258_v40 = vpop.f32.mrf.mxu1  ;;  %v1320_v57 = vadd.f32 %v1319_v56, %v1318_v60 }
 0x201   : > { %v1420_v32 = vsel %vm1129_vm10, %v1383_v21, 0.0  ;;  %v1389_v61 = vmul.f32 %v1258_v40, %v1258_v40  ;;  %v1331_v54 = vsel %vm1129_vm10, %v1258_v40, 0.0  ;;  %v1290_v40 = vpop.f32.mrf.mxu3 }
 0x202   : > { %v1421_v58 = vadd.f32 %v1420_v32, %v1419_v47  ;;  %v1341_v32 = vsel %vm1129_vm10, %v1270_v26, 0.0 }
 0x203   : > { %v1432_v55 = vsel %vm1129_vm10, %v1389_v61, 0.0 }
 0x206   : > { %v1245_v28 = vpop.f32.mrf.mxu0 }
 0x207   : > { %v1384_v1 = vmul.f32 %v1245_v28, %v1245_v28  ;;  %v1321_v49 = vsel %vm1129_vm10, %v1245_v28, 0.0 }
 0x208   : > { %v1322_v27 = vadd.f32 %v1321_v49, %v1320_v57  ;;  %v1260_v38 = vpop.f32.mrf.mxu1  ;;  %v1442_v57 = vsel %vm1129_vm10, %v1394_v63, 0.0 }
 0x209   : > { %v1422_v24 = vsel %vm1129_vm10, %v1384_v1, 0.0  ;;  %v1390_v39 = vmul.f32 %v1260_v38, %v1260_v38  ;;  %v1333_v41 = vsel %vm1129_vm10, %v1260_v38, 0.0  ;;  %v1440_v1 = vsel %vm1129_vm10, %v1393_v5, 0.0 }
 0x20a   : > { %v1423_v11 = vadd.f32 %v1422_v24, %v1421_v58  ;;  %v1324_v2 = vadd.f32 %v1323_v20, %v1322_v27  ;;  %v1395_v24 = vmul.f32 %v1273_v50, %v1273_v50 }
 0x20b   : > { %v1434_v33 = vsel %vm1129_vm10, %v1390_v39, 0.0  ;;  %v1355_v39 = vsel %vm1129_vm10, %v2718_v44, 0.0 }
 0x20c   : > { %v1425_v18 = vadd.f32 %v1424_v53, %v1423_v11  ;;  %v1326_v19 = vadd.f32 %v1325_v30, %v1324_v2  ;;  %v1444_v38 = vsel %vm1129_vm10, %v1395_v24, 0.0  ;;  %v1345_v2 = vsel %vm1129_vm10, %v1275_v45, 0.0 }
 0x20e   : > { %v1427_v22 = vadd.f32 %v1426_v62, %v1425_v18  ;;  %v1328_v12 = vadd.f32 %v1327_v4, %v1326_v19 }
 0x210   : > { %v1429_v59 = vadd.f32 %v1428_v7, %v1427_v22  ;;  %v1330_v48 = vadd.f32 %v1329_v10, %v1328_v12 }
 0x212   : > { %v1431_v23 = vadd.f32 %v1430_v13, %v1429_v59  ;;  %v1332_v37 = vadd.f32 %v1331_v54, %v1330_v48  ;;  %v1401_v54 = vmul.f32 %v2718_v44, %v2718_v44 }
 0x214   : > { %v1433_v29 = vadd.f32 %v1432_v55, %v1431_v23  ;;  %v1334_v9 = vadd.f32 %v1333_v41, %v1332_v37 }
 0x216   : > { %v1435_v35 = vadd.f32 %v1434_v33, %v1433_v29 }
 0x224   : > { %v1278_v14 = vpop.f32.mrf.mxu2 }
 0x225   : > { %v1397_v26 = vmul.f32 %v1278_v14, %v1278_v14  ;;  %v1347_v62 = vsel %vm1129_vm10, %v1278_v14, 0.0 }
 0x226   : > { %v1293_v49 = vpop.f32.mrf.mxu3 }
 0x227   : > { %v1448_v22 = vsel %vm1129_vm10, %v1397_v26, 0.0  ;;  %v1359_v14 = vsel %vm1129_vm10, %v1293_v49, 0.0 }
 0x22c   : > { %v1280_v58 = vpop.f32.mrf.mxu2 }
 0x22d   : > { %v1398_v50 = vmul.f32 %v1280_v58, %v1280_v58  ;;  %v1349_v12 = vsel %vm1129_vm10, %v1280_v58, 0.0 }
 0x22e   : > { %v1295_v18 = vpop.f32.mrf.mxu3 }
 0x22f   : > { %v1450_v59 = vsel %vm1129_vm10, %v1398_v50, 0.0 }
 0x231   : > { %v1263_v46 = vpop.f32.mrf.mxu1 }
 0x232   : > { %v1391_v16 = vmul.f32 %v1263_v46, %v1263_v46  ;;  %v1335_v6 = vsel %vm1129_vm10, %v1263_v46, 0.0 }
 0x233   : > { %v1336_v36 = vadd.f32 %v1335_v6, %v1334_v9  ;;  %v1357_v9 = vsel %vm1129_vm10, %v1290_v40, 0.0 }
 0x234   : > { %v1436_v52 = vsel %vm1129_vm10, %v1391_v16, 0.0  ;;  %v1402_v16 = vmul.f32 %v1290_v40, %v1290_v40 }
 0x235   : > { %v1437_v43 = vadd.f32 %v1436_v52, %v1435_v35  ;;  %v1403_v35 = vmul.f32 %v1293_v49, %v1293_v49 }
 0x237   : > { %v1460_v44 = vsel %vm1129_vm10, %v1403_v35, 0.0 }
 0x239   : > { %v1265_v31 = vpop.f32.mrf.mxu1 }
 0x23a   : > { %v1392_v42 = vmul.f32 %v1265_v31, %v1265_v31  ;;  %v1337_v34 = vsel %vm1129_vm10, %v1265_v31, 0.0 }
 0x23b   : > { %v1338_v21 = vadd.f32 %v1337_v34, %v1336_v36  ;;  %v1458_v34 = vsel %vm1129_vm10, %v1402_v16, 0.0 }
 0x23c   : > { %v1438_v28 = vsel %vm1129_vm10, %v1392_v42, 0.0  ;;  %v1456_v42 = vsel %vm1129_vm10, %v1401_v54, 0.0 }
 0x23d   : > { %v1439_v25 = vadd.f32 %v1438_v28, %v1437_v43  ;;  %v1340_v56 = vadd.f32 %v1339_v3, %v1338_v21  ;;  %v1404_v21 = vmul.f32 %v1295_v18, %v1295_v18 }
 0x23f   : > { %v1441_v60 = vadd.f32 %v1440_v1, %v1439_v25  ;;  %v1342_v47 = vadd.f32 %v1341_v32, %v1340_v56  ;;  %v1361_v25 = vsel %vm1129_vm10, %v1295_v18, 0.0  ;;  %v1462_v56 = vsel %vm1129_vm10, %v1404_v21, 0.0 }
 0x241   : > { %v1443_v27 = vadd.f32 %v1442_v57, %v1441_v60  ;;  %v1344_v11 = vadd.f32 %v1343_v51, %v1342_v47 }
 0x243   : > { %v1445_v20 = vadd.f32 %v1444_v38, %v1443_v27  ;;  %v1346_v53 = vadd.f32 %v1345_v2, %v1344_v11 }
 0x245   : > { %v1447_v19 = vadd.f32 %v1446_v15, %v1445_v20  ;;  %v1348_v8 = vadd.f32 %v1347_v62, %v1346_v53 }
 0x247   : > { %v1449_v4 = vadd.f32 %v1448_v22, %v1447_v19  ;;  %v1350_v0 = vadd.f32 %v1349_v12, %v1348_v8 }
 0x249   : > { %v1451_v61 = vadd.f32 %v1450_v59, %v1449_v4 }
 0x256   : > { %v1283_v30 = vpop.f32.mrf.mxu2 }
 0x257   : > { %v1399_v46 = vmul.f32 %v1283_v30, %v1283_v30  ;;  %v1351_v7 = vsel %vm1129_vm10, %v1283_v30, 0.0 }
 0x258   : > { %v1352_v13 = vadd.f32 %v1351_v7, %v1350_v0 }
 0x259   : > { %v1452_v10 = vsel %vm1129_vm10, %v1399_v46, 0.0 }
 0x25a   : > { %v1453_v31 = vadd.f32 %v1452_v10, %v1451_v61 }
 0x25d   : > { %v1298_v48 = vpop.f32.mrf.mxu3 }
 0x25e   : > { %v1285_v23 = vpop.f32.mrf.mxu2  ;;  %v1405_v40 = vmul.f32 %v1298_v48, %v1298_v48  ;;  %v1363_v60 = vsel %vm1129_vm10, %v1298_v48, 0.0 }
 0x25f   : > { %v1353_v45 = vsel %vm1129_vm10, %v1285_v23, 0.0  ;;  %v1400_v37 = vmul.f32 %v1285_v23, %v1285_v23 }
 0x260   : > { %v1354_v55 = vadd.f32 %v1353_v45, %v1352_v13  ;;  %v1464_v47 = vsel %vm1129_vm10, %v1405_v40, 0.0 }
 0x261   : > { %v1454_v29 = vsel %vm1129_vm10, %v1400_v37, 0.0 }
 0x262   : > { %v1356_v41 = vadd.f32 %v1355_v39, %v1354_v55  ;;  %v1455_v6 = vadd.f32 %v1454_v29, %v1453_v31 }
 0x264   : > { %v1358_v33 = vadd.f32 %v1357_v9, %v1356_v41  ;;  %v1457_v52 = vadd.f32 %v1456_v42, %v1455_v6 }
 0x265   : > { %v1300_v36 = vpop.f32.mrf.mxu3 }
 0x266   : > { %v1459_v28 = vadd.f32 %v1458_v34, %v1457_v52  ;;  %v1360_v43 = vadd.f32 %v1359_v14, %v1358_v33  ;;  %v1406_v57 = vmul.f32 %v1300_v36, %v1300_v36  ;;  %v1365_v58 = vsel %vm1129_vm10, %v1300_v36, 0.0 }
 0x268   : > { %v1461_v5 = vadd.f32 %v1460_v44, %v1459_v28  ;;  %v1362_v3 = vadd.f32 %v1361_v25, %v1360_v43  ;;  %v1466_v11 = vsel %vm1129_vm10, %v1406_v57, 0.0 }
 0x26a   : > { %v1463_v1 = vadd.f32 %v1462_v56, %v1461_v5  ;;  %v1364_v32 = vadd.f32 %v1363_v60, %v1362_v3 }
 0x26c   : > { %v1465_v24 = vadd.f32 %v1464_v47, %v1463_v1  ;;  %v1366_v51 = vadd.f32 %v1365_v58, %v1364_v32 }
 0x26e   : > { %v1303_v63 = vpop.f32.mrf.mxu3  ;;  %v1467_v17 = vadd.f32 %v1466_v11, %v1465_v24 }
 0x26f   : > { %v1407_v49 = vmul.f32 %v1303_v63, %v1303_v63  ;;  %v1367_v27 = vsel %vm1129_vm10, %v1303_v63, 0.0 }
 0x270   : > { %v1368_v20 = vadd.f32 %v1367_v27, %v1366_v51 }
 0x271   : > { %v1468_v38 = vsel %vm1129_vm10, %v1407_v49, 0.0 }
 0x272   : > { %v1469_v26 = vadd.f32 %v1468_v38, %v1467_v17 }
 0x276   : > { %v1305_v2 = vpop.f32.mrf.mxu3 }
 0x277   : > { %v1369_v53 = vsel %vm1129_vm10, %v1305_v2, 0.0  ;;  %v1408_v15 = vmul.f32 %v1305_v2, %v1305_v2 }
 0x278   : > { %v1370_v18 = vadd.f32 %v1369_v53, %v1368_v20 }
 0x279   : > { %v1470_v30 = vsel %vm1129_vm10, %v1408_v15, 0.0 }
 0x27a   : > { %v1371_v19 = vrot.slane %v1370_v18, 4  ;;  %v1471_v62 = vadd.f32 %v1470_v30, %v1469_v26 }
 0x27c   : > { %v1372_v8 = vadd.f32 %v1371_v19, %v1370_v18  ;;  %v1472_v22 = vrot.slane %v1471_v62, 4 }
 0x27e   : > { %v1373_v50 = vrot.slane %v1372_v8, 2  ;;  %v1473_v46 = vadd.f32 %v1472_v22, %v1471_v62 }
 0x280   : > { %v1374_v4 = vadd.f32 %v1373_v50, %v1372_v8  ;;  %v1474_v12 = vrot.slane %v1473_v46, 2 }
 0x282   : > { %v1375_v7 = vrot.slane %v1374_v4, 1  ;;  %v1475_v0 = vadd.f32 %v1474_v12, %v1473_v46 }
 0x284   : > { %v1476_v59 = vrot.slane %v1475_v0, 1  ;;  %v1376_v10 = vadd.f32 %v1375_v7, %v1374_v4 }
 0x286   : > { %v1477_v48 = vadd.f32 %v1476_v59, %v1475_v0 }
 0x288   : > { %v1479_v13 = vsel %vm1478_vm12, %v1376_v10, %v1477_v48 }
 0x289   : > { %1481 = vst.msk [vmem:[%s160_s30] sm:$0x3] %vm1480_vm13, %v1479_v13 }
 0x28a   : > { %1804 = shalt.err (!%p1801_p5)
}
 0x28b   : > { %1713 = dma.vmem_to_hbm [thread:$0]  (%p1920_p4), %s1497_s3, 32, %s1499_s4, %s1483_s12  }
 0x28c PF: > { %p1719_p6 = scmp.ge.s32.totalorder %s1855_s14, 2  ;;  %s1510_s20 = sand.u32 1, %s1835_s9  }
 0x28d   : > { %s1511_s23 = scalar_lea.sflag [#allocation3], %s1510_s20 }
 0x28e   : > { %p1716_p7 = pnand %p1719_p6, %p1927_p8 }
 0x290   : > { %p1717_p9 = pneg %p1716_p7 }
 0x292   : > { %1830 = dma.done.wait (%p1717_p9), %s1511_s23, 32  }
 0x293   : > { %1832 = vsyncadd (%p1717_p9), %s1511_s23, 4294967264  ;;  %s15_s14 = sadd.s32 1, %s1855_s14   ;;  %s2810_s9 = smov %s1839_s10 }
 0x294   : > { %p12_p10 = scmp.ge.s32.totalorder %s15_s14, 4   ;;  %s2811_s10 = smov %s1843_s11 }
 0x295   : > { %s2812_s11 = smov %s1933_s22  ;;  %s2813_s12 = smov %s1851_s13 }
 0x296   : > { %s2814_s13 = smov %s2816_s17  ;;  %14 = sbr.rel (!%p12_p10) target bundleno = 4 (0x4), region = 63 }
 0x29b   :  { %1517 = vsyncpa [#allocation3], 1 }
 0x29c   :  { %1519 = vsyncpa [#allocation3 + $0x1], 1 }

</bundles_post_ra>
